<compile_context>
chip_gen: v7x
topology: tpu7x:2x2x1
jax: 0.10.0
libtpu: 0.0.40
codegen_flags: <defaults>
</compile_context>

<pallas_src>
import numpy as np
import jax
import jax.numpy as jnp
from jax.experimental import pallas as pl
from jax.experimental.pallas import tpu as pltpu


# ---------------------------------------------------------------------------
# Kernel
# ---------------------------------------------------------------------------
def bilstm_kernel(x_ref, len_ref, dir_ref, wih_ref, whh_ref, b_ref, h0_ref,
                  out_ref, gx_ref, mask_ref):
    """Fused bidirectional LSTM recurrence for one batch tile.

    x_ref    : (T, Bt, 2E) bf16  time-major fused input, x_ref[t,b] = [x[t,b] | x[T-1-t,b]]
    len_ref  : (Bt, 1)     int32 sequence lengths
    dir_ref  : (1, 2H)     int32 0 on forward columns, 1 on backward columns
    wih_ref  : (2E, 8H)    bf16  block-diagonal input weights, gate layout [i|f|g|o]x(2H)
    whh_ref  : (2H, 8H)    f32   block-diagonal recurrent weights, same layout
    b_ref    : (1, 8H)     f32   fused bias (b_ih + b_hh per direction)
    h0_ref   : (Bt, 2H)    f32   initial hidden state [h0_fwd | h0_bwd]
    out_ref  : (Bt, Opad)  f32   lane-dense output slab (Opad = 2H rounded to 128)
    gx_ref   : (T, Bt, 8H) f32   scratch: precomputed input projections (+bias)
    mask_ref : (T, Bt, 2H) f32   scratch: precomputed pack_padded update masks
    """
    T, Bt, _ = x_ref.shape
    H2 = h0_ref.shape[1]

    wih = wih_ref[...]
    bias = b_ref[...]
    lens = len_ref[...]                    # (Bt, 1) int32
    d = dir_ref[...]                       # (1, 2H) int32
    not_d = 1 - d

    # ---- off-serial-path prologue: input projections + update masks --------
    # Per-step (Bt,2E)@(2E,8H) bf16 dots write tile-clean gx_ref[t] slabs; the
    # total MXU work equals one big pass and none of it sits on the recurrence.
    for t in range(T):
        gx_ref[t] = (jnp.dot(x_ref[t], wih,
                             preferred_element_type=jnp.float32) + bias)
        # fwd half updates while t < len; bwd half while (T-1-t) < len.
        t_eff = t * not_d + (T - 1 - t) * d                   # (1, 2H)
        mask_ref[t] = (t_eff < lens).astype(jnp.float32)      # (Bt, 2H)

    w_hh = whh_ref[...]
    h0 = h0_ref[...]

    def body(t, carry):
        h, c = carry                                          # (Bt, 2H) each
        gates = gx_ref[t] + jnp.dot(h, w_hh,
                                    preferred_element_type=jnp.float32)  # (Bt, 8H)
        # Gate layout [ i | f | g | o ], each block 2H ([fwd|bwd]).
        # sigmoid(x) = 0.5*tanh(0.5*x) + 0.5 -> a single EUP pass for i/f/o.
        sg = 0.5 * jnp.tanh(0.5 * gates) + 0.5
        i_g = sg[:, 0 * H2:1 * H2]
        f_g = sg[:, 1 * H2:2 * H2]
        o_g = sg[:, 3 * H2:4 * H2]
        g_g = jnp.tanh(gates[:, 2 * H2:3 * H2])
        # TODO(synk): if these 2H-lane slices show up as per-step lane rotates
        #             in the bundle dump, broadcast h/c across the four gate
        #             blocks and extract once at the end instead.
        c_new = f_g * c + i_g * g_g
        h_new = o_g * jnp.tanh(c_new)
        m = mask_ref[t]                                       # precomputed mask
        return h + m * (h_new - h), c + m * (c_new - c)

    h_fin, _ = jax.lax.fori_loop(0, T, body, (h0, jnp.zeros_like(h0)),
                                 unroll=True)

    pad = out_ref.shape[1] - H2
    if pad:
        h_fin = jnp.concatenate(
            [h_fin, jnp.zeros((Bt, pad), h_fin.dtype)], axis=-1)
    out_ref[...] = h_fin


# ---------------------------------------------------------------------------
# One-time weight fusion (hoisted out of the per-call path)
# ---------------------------------------------------------------------------
def _fuse_block_diag(wf, wb):
    """(df,4H),(db,4H) with torch gate order (i,f,g,o) ->
       (df+db, 8H) block-diagonal, fused layout [i_f i_b | f_f f_b | g_f g_b | o_f o_b]."""
    df, db = wf.shape[0], wb.shape[0]
    H = wf.shape[1] // 4
    blocks = []
    for k in range(4):
        top = jnp.concatenate(
            [wf[:, k * H:(k + 1) * H], jnp.zeros((df, H), wf.dtype)], axis=1)
        bot = jnp.concatenate(
            [jnp.zeros((db, H), wb.dtype), wb[:, k * H:(k + 1) * H]], axis=1)
        blocks.append(jnp.concatenate([top, bot], axis=0))
    return jnp.concatenate(blocks, axis=1)


def _fuse_bias(bf, bb):
    H = bf.shape[1] // 4
    parts = []
    for k in range(4):
        parts += [bf[:, k * H:(k + 1) * H], bb[:, k * H:(k + 1) * H]]
    return jnp.concatenate(parts, axis=1)


def prepare_fused_params(params):
    """Init-time fusion of per-direction PyTorch-layout weights into the
    block-diagonal layout the kernel consumes (not re-run per forward)."""
    H = params["w_hh_f"].shape[0]
    return {
        # bf16 MXU inputs for the (off-serial-path) input projection.
        "w_ih": _fuse_block_diag(params["w_ih_f"],
                                 params["w_ih_b"]).astype(jnp.bfloat16),
        # Recurrent weights stay f32: they sit on the serial chain.
        "w_hh": _fuse_block_diag(params["w_hh_f"], params["w_hh_b"]),
        "b":    _fuse_bias(params["b_f"], params["b_b"]),
        "dir":  jnp.concatenate([jnp.zeros((1, H), jnp.int32),
                                 jnp.ones((1, H), jnp.int32)], axis=1),
    }


# ---------------------------------------------------------------------------
# Per-call wrapper
# ---------------------------------------------------------------------------
@jax.jit
def bilstm_encode(x_bte, lengths, h0, fused):
    """x_bte: (B,T,E) f32 embeddings, lengths: (B,), h0: (2,B,H) -> (B, 2H)."""
    B, T, E = x_bte.shape
    H2 = 2 * h0.shape[2]
    H8 = 4 * H2
    BT = 8                                       # batch sublane tile
    B_pad = BT * pl.cdiv(B, BT)
    out_pad = 128 * pl.cdiv(H2, 128)             # lane-dense output slab width

    # Time-major fused fwd/bwd input: step t carries [x[t] | x[T-1-t]].
    x_tbe = jnp.transpose(x_bte, (1, 0, 2)).astype(jnp.float32)      # (T, B, E)
    x_both = jnp.concatenate([x_tbe, x_tbe[::-1]], axis=-1)          # (T, B, 2E)
    x_both = jnp.pad(x_both, ((0, 0), (0, B_pad - B), (0, 0)))
    x_both = x_both.astype(jnp.bfloat16)                             # (T, B_pad, 2E)

    lens = jnp.pad(lengths.astype(jnp.int32), (0, B_pad - B)).reshape(B_pad, 1)
    h0_cat = jnp.concatenate([h0[0], h0[1]], axis=-1).astype(jnp.float32)
    h0_cat = jnp.pad(h0_cat, ((0, B_pad - B), (0, 0)))               # (B_pad, 2H)

    nb = B_pad // BT
    grid_spec = pltpu.PrefetchScalarGridSpec(
        num_scalar_prefetch=0,
        grid=(nb,),
        in_specs=[
            pl.BlockSpec((T, BT, 2 * E), lambda b: (0, b, 0)),   # x (batch tiled)
            pl.BlockSpec((BT, 1),        lambda b: (b, 0)),      # lengths
            pl.BlockSpec((1, H2),        lambda b: (0, 0)),      # dir vector
            pl.BlockSpec((2 * E, H8),    lambda b: (0, 0)),      # W_ih (fused)
            pl.BlockSpec((H2, H8),       lambda b: (0, 0)),      # W_hh (fused)
            pl.BlockSpec((1, H8),        lambda b: (0, 0)),      # bias
            pl.BlockSpec((BT, H2),       lambda b: (b, 0)),      # h0
        ],
        out_specs=pl.BlockSpec((BT, out_pad), lambda b: (b, 0)),
        scratch_shapes=[pltpu.VMEM((T, BT, H8), jnp.float32),    # gx
                        pltpu.VMEM((T, BT, H2), jnp.float32)],   # masks
    )
    out = pl.pallas_call(
        bilstm_kernel,
        out_shape=jax.ShapeDtypeStruct((B_pad, out_pad), jnp.float32),
        grid_spec=grid_spec,
        compiler_params=pltpu.CompilerParams(
            dimension_semantics=("parallel",)),   # shards batch across TCs on v7x
    )(x_both, lens, fused["dir"], fused["w_ih"], fused["w_hh"], fused["b"],
      h0_cat)
    return out[:B, :H2]


# ---------------------------------------------------------------------------
# Pure-JAX reference for correctness checking
# ---------------------------------------------------------------------------
def ref_bilstm(x_bte, lengths, params):
    B, T, E = x_bte.shape

    def cell(x_t, h, c, wih, whh, b):
        gates = x_t @ wih + h @ whh + b
        i, f, g, o = jnp.split(gates, 4, axis=-1)
        c = jax.nn.sigmoid(f) * c + jax.nn.sigmoid(i) * jnp.tanh(g)
        h = jax.nn.sigmoid(o) * jnp.tanh(c)
        return h, c

    h, c = params["h0_f"], jnp.zeros_like(params["h0_f"])
    for t in range(T):
        hn, cn = cell(x_bte[:, t], h, c,
                      params["w_ih_f"], params["w_hh_f"], params["b_f"])
        m = (t < lengths)[:, None]
        h, c = jnp.where(m, hn, h), jnp.where(m, cn, c)
    h_f = h

    h, c = params["h0_b"], jnp.zeros_like(params["h0_b"])
    for t in range(T - 1, -1, -1):
        hn, cn = cell(x_bte[:, t], h, c,
                      params["w_ih_b"], params["w_hh_b"], params["b_b"])
        m = (t < lengths)[:, None]
        h, c = jnp.where(m, hn, h), jnp.where(m, cn, c)
    h_b = h
    return jnp.concatenate([h_f, h_b], axis=-1)


if __name__ == "__main__":
    # Module hyper-parameters (small, consistent with BiLSTMEncoder.__init__).
    vocab_size, emb_dim, hidden_dim, num_layers = 100, 32, 32, 1
    H = hidden_dim // 2
    B, T = 2, 8

    key = jax.random.PRNGKey(0)
    keys = jax.random.split(key, 12)
    bound = 1.0 / np.sqrt(H)

    def u(k, shape):
        return jax.random.uniform(k, shape, jnp.float32, -bound, bound)

    # nn.Embedding default init ~ N(0, 1)
    emb_table = jax.random.normal(keys[0], (vocab_size, emb_dim), jnp.float32)

    # PyTorch LSTM stores W_ih (4H, E) / W_hh (4H, H); we keep transposes so
    # the kernel computes x @ W_ih^T and h @ W_hh^T as plain matmuls.
    params = {
        "w_ih_f": u(keys[1], (emb_dim, 4 * H)),
        "w_hh_f": u(keys[2], (H, 4 * H)),
        "b_f":    u(keys[3], (1, 4 * H)) + u(keys[4], (1, 4 * H)),  # b_ih + b_hh
        "w_ih_b": u(keys[5], (emb_dim, 4 * H)),
        "w_hh_b": u(keys[6], (H, 4 * H)),
        "b_b":    u(keys[7], (1, 4 * H)) + u(keys[8], (1, 4 * H)),
    }

    # One-time weight fusion (hoisted out of the per-forward path).
    fused = prepare_fused_params(params)

    # _initialise_states: torch.randn(2, B, hidden_dim // 2) used as h0.
    # NOTE: the module passes a single tensor where nn.LSTM expects (h0, c0);
    # we interpret it as h0 with c0 = 0 (same interpretation as earlier revs).
    h0 = jax.random.normal(keys[9], (2, B, H), jnp.float32)

    # Inputs: token ids and per-sequence lengths (enforce_sorted=False).
    sents = jax.random.randint(keys[10], (B, T), 0, vocab_size, dtype=jnp.int32)
    lengths = jnp.array([T, 5], dtype=jnp.int32)

    # Embedding lookup (glue, plain JAX gather).
    x_bte = jnp.take(emb_table, sents, axis=0)        # (B, T, E)

    out = bilstm_encode(x_bte, lengths, h0, fused)    # (B, hidden_dim)
    out = jax.block_until_ready(out)

    ref = ref_bilstm(x_bte, lengths,
                     dict(params, h0_f=h0[0], h0_b=h0[1]))
    # Tolerance accounts for the bf16 cast on the input-projection MXU operands.
    np.testing.assert_allclose(np.asarray(out), np.asarray(ref),
                               rtol=3e-2, atol=3e-2)

    print("KERNEL_OK")
</pallas_src>

<mosaic_0001>
module attributes {stable_mosaic.version = 11 : i64} {
  func.func @bilstm_kernel(%arg0: i32, %arg1: memref<8x8x64xbf16, #tpu.memory_space<vmem>>, %arg2: memref<8x1xi32, #tpu.memory_space<vmem>>, %arg3: memref<1x32xi32, #tpu.memory_space<vmem>>, %arg4: memref<64x128xbf16, #tpu.memory_space<vmem>>, %arg5: memref<32x128xf32, #tpu.memory_space<vmem>>, %arg6: memref<1x128xf32, #tpu.memory_space<vmem>>, %arg7: memref<8x32xf32, #tpu.memory_space<vmem>>, %arg8: memref<8x128xf32, #tpu.memory_space<vmem>>, %arg9: memref<8x8x128xf32, #tpu.memory_space<vmem>>, %arg10: memref<8x8x32xf32, #tpu.memory_space<vmem>>) attributes {dimension_semantics = [#tpu.dimension_semantics<parallel>], iteration_bounds = array<i64: 1>, scalar_prefetch = 0 : i64, scratch_operands = 2 : i64, tpu.core_type = #tpu.core_type<tc>, window_params = [{transform_indices = @transform_0, window_bounds = array<i64: 8, 8, 64>}, {transform_indices = @transform_1, window_bounds = array<i64: 8, 1>}, {pipeline_mode = #tpu.pipeline_mode<synchronous>, transform_indices = @transform_2, window_bounds = array<i64: 1, 32>}, {pipeline_mode = #tpu.pipeline_mode<synchronous>, transform_indices = @transform_3, window_bounds = array<i64: 64, 128>}, {pipeline_mode = #tpu.pipeline_mode<synchronous>, transform_indices = @transform_4, window_bounds = array<i64: 32, 128>}, {pipeline_mode = #tpu.pipeline_mode<synchronous>, transform_indices = @transform_5, window_bounds = array<i64: 1, 128>}, {transform_indices = @transform_6, window_bounds = array<i64: 8, 32>}, {transform_indices = @transform_7, window_bounds = array<i64: 8, 128>}]} {
    %c0 = arith.constant 0 : index
    %c0_0 = arith.constant 0 : index
    %0 = vector.load %arg4[%c0, %c0_0] : memref<64x128xbf16, #tpu.memory_space<vmem>>, vector<64x128xbf16>
    %c0_1 = arith.constant 0 : index
    %c0_2 = arith.constant 0 : index
    %1 = vector.load %arg6[%c0_1, %c0_2] : memref<1x128xf32, #tpu.memory_space<vmem>>, vector<1x128xf32>
    %c0_3 = arith.constant 0 : index
    %c0_4 = arith.constant 0 : index
    %2 = vector.load %arg2[%c0_3, %c0_4] : memref<8x1xi32, #tpu.memory_space<vmem>>, vector<8x1xi32>
    %c0_5 = arith.constant 0 : index
    %c0_6 = arith.constant 0 : index
    %3 = vector.load %arg3[%c0_5, %c0_6] : memref<1x32xi32, #tpu.memory_space<vmem>>, vector<1x32xi32>
    %c1_i32 = arith.constant 1 : i32
    %4 = vector.broadcast %c1_i32 : i32 to vector<1x32xi32>
    %5 = arith.subi %4, %3 : vector<1x32xi32>
    %c0_7 = arith.constant 0 : index
    %c0_8 = arith.constant 0 : index
    %c0_9 = arith.constant 0 : index
    %6 = vector.load %arg1[%c0_7, %c0_8, %c0_9] : memref<8x8x64xbf16, #tpu.memory_space<vmem>>, vector<1x8x64xbf16>
    %7 = vector.shape_cast %6 : vector<1x8x64xbf16> to vector<8x64xbf16>
    %cst = arith.constant dense<0.000000e+00> : vector<8x128xf32>
    %8 = tpu.matmul %7, %0, %cst {dimension_numbers = #tpu.dot_dimension_numbers<[1], [0], [0], [1], [0, 0, 1, 1], [], []>} : vector<8x64xbf16>, vector<64x128xbf16>, vector<8x128xf32> -> vector<8x128xf32>
    %9 = vector.broadcast %1 : vector<1x128xf32> to vector<8x128xf32>
    %10 = arith.addf %8, %9 : vector<8x128xf32>
    %c0_10 = arith.constant 0 : index
    %c0_11 = arith.constant 0 : index
    %c0_12 = arith.constant 0 : index
    %11 = vector.load %arg9[%c0_10, %c0_11, %c0_12] : memref<8x8x128xf32, #tpu.memory_space<vmem>>, vector<1x8x128xf32>
    %12 = vector.shape_cast %11 : vector<1x8x128xf32> to vector<8x128xf32>
    %13 = vector.shape_cast %10 : vector<8x128xf32> to vector<1x8x128xf32>
    tpu.vector_store %arg9[%c0_10, %c0_11, %c0_12], %13 {strides = array<i32>} : memref<8x8x128xf32, #tpu.memory_space<vmem>>, vector<1x8x128xf32>,
    %c0_i32 = arith.constant 0 : i32
    %14 = vector.broadcast %c0_i32 : i32 to vector<1x32xi32>
    %15 = arith.muli %14, %5 : vector<1x32xi32>
    %c7_i32 = arith.constant 7 : i32
    %16 = vector.broadcast %c7_i32 : i32 to vector<1x32xi32>
    %17 = arith.muli %16, %3 : vector<1x32xi32>
    %18 = arith.addi %15, %17 : vector<1x32xi32>
    %19 = vector.broadcast %18 : vector<1x32xi32> to vector<8x32xi32>
    %20 = vector.broadcast %2 : vector<8x1xi32> to vector<8x32xi32>
    %21 = arith.cmpi slt, %19, %20 : vector<8x32xi32>
    %22 = arith.extui %21 : vector<8x32xi1> to vector<8x32xi32>
    %23 = arith.sitofp %22 : vector<8x32xi32> to vector<8x32xf32>
    %c0_13 = arith.constant 0 : index
    %c0_14 = arith.constant 0 : index
    %c0_15 = arith.constant 0 : index
    %24 = vector.load %arg10[%c0_13, %c0_14, %c0_15] : memref<8x8x32xf32, #tpu.memory_space<vmem>>, vector<1x8x32xf32>
    %25 = vector.shape_cast %24 : vector<1x8x32xf32> to vector<8x32xf32>
    %26 = vector.shape_cast %23 : vector<8x32xf32> to vector<1x8x32xf32>
    tpu.vector_store %arg10[%c0_13, %c0_14, %c0_15], %26 {strides = array<i32>} : memref<8x8x32xf32, #tpu.memory_space<vmem>>, vector<1x8x32xf32>,
    %c1 = arith.constant 1 : index
    %c0_16 = arith.constant 0 : index
    %c0_17 = arith.constant 0 : index
    %27 = vector.load %arg1[%c1, %c0_16, %c0_17] : memref<8x8x64xbf16, #tpu.memory_space<vmem>>, vector<1x8x64xbf16>
    %28 = vector.shape_cast %27 : vector<1x8x64xbf16> to vector<8x64xbf16>
    %cst_18 = arith.constant dense<0.000000e+00> : vector<8x128xf32>
    %29 = tpu.matmul %28, %0, %cst_18 {dimension_numbers = #tpu.dot_dimension_numbers<[1], [0], [0], [1], [0, 0, 1, 1], [], []>} : vector<8x64xbf16>, vector<64x128xbf16>, vector<8x128xf32> -> vector<8x128xf32>
    %30 = vector.broadcast %1 : vector<1x128xf32> to vector<8x128xf32>
    %31 = arith.addf %29, %30 : vector<8x128xf32>
    %c1_19 = arith.constant 1 : index
    %c0_20 = arith.constant 0 : index
    %c0_21 = arith.constant 0 : index
    %32 = vector.load %arg9[%c1_19, %c0_20, %c0_21] : memref<8x8x128xf32, #tpu.memory_space<vmem>>, vector<1x8x128xf32>
    %33 = vector.shape_cast %32 : vector<1x8x128xf32> to vector<8x128xf32>
    %34 = vector.shape_cast %31 : vector<8x128xf32> to vector<1x8x128xf32>
    tpu.vector_store %arg9[%c1_19, %c0_20, %c0_21], %34 {strides = array<i32>} : memref<8x8x128xf32, #tpu.memory_space<vmem>>, vector<1x8x128xf32>,
    %c1_i32_22 = arith.constant 1 : i32
    %35 = vector.broadcast %c1_i32_22 : i32 to vector<1x32xi32>
    %36 = arith.muli %35, %5 : vector<1x32xi32>
    %c6_i32 = arith.constant 6 : i32
    %37 = vector.broadcast %c6_i32 : i32 to vector<1x32xi32>
    %38 = arith.muli %37, %3 : vector<1x32xi32>
    %39 = arith.addi %36, %38 : vector<1x32xi32>
    %40 = vector.broadcast %39 : vector<1x32xi32> to vector<8x32xi32>
    %41 = vector.broadcast %2 : vector<8x1xi32> to vector<8x32xi32>
    %42 = arith.cmpi slt, %40, %41 : vector<8x32xi32>
    %43 = arith.extui %42 : vector<8x32xi1> to vector<8x32xi32>
    %44 = arith.sitofp %43 : vector<8x32xi32> to vector<8x32xf32>
    %c1_23 = arith.constant 1 : index
    %c0_24 = arith.constant 0 : index
    %c0_25 = arith.constant 0 : index
    %45 = vector.load %arg10[%c1_23, %c0_24, %c0_25] : memref<8x8x32xf32, #tpu.memory_space<vmem>>, vector<1x8x32xf32>
    %46 = vector.shape_cast %45 : vector<1x8x32xf32> to vector<8x32xf32>
    %47 = vector.shape_cast %44 : vector<8x32xf32> to vector<1x8x32xf32>
    tpu.vector_store %arg10[%c1_23, %c0_24, %c0_25], %47 {strides = array<i32>} : memref<8x8x32xf32, #tpu.memory_space<vmem>>, vector<1x8x32xf32>,
    %c2 = arith.constant 2 : index
    %c0_26 = arith.constant 0 : index
    %c0_27 = arith.constant 0 : index
    %48 = vector.load %arg1[%c2, %c0_26, %c0_27] : memref<8x8x64xbf16, #tpu.memory_space<vmem>>, vector<1x8x64xbf16>
    %49 = vector.shape_cast %48 : vector<1x8x64xbf16> to vector<8x64xbf16>
    %cst_28 = arith.constant dense<0.000000e+00> : vector<8x128xf32>
    %50 = tpu.matmul %49, %0, %cst_28 {dimension_numbers = #tpu.dot_dimension_numbers<[1], [0], [0], [1], [0, 0, 1, 1], [], []>} : vector<8x64xbf16>, vector<64x128xbf16>, vector<8x128xf32> -> vector<8x128xf32>
    %51 = vector.broadcast %1 : vector<1x128xf32> to vector<8x128xf32>
    %52 = arith.addf %50, %51 : vector<8x128xf32>
    %c2_29 = arith.constant 2 : index
    %c0_30 = arith.constant 0 : index
    %c0_31 = arith.constant 0 : index
    %53 = vector.load %arg9[%c2_29, %c0_30, %c0_31] : memref<8x8x128xf32, #tpu.memory_space<vmem>>, vector<1x8x128xf32>
    %54 = vector.shape_cast %53 : vector<1x8x128xf32> to vector<8x128xf32>
    %55 = vector.shape_cast %52 : vector<8x128xf32> to vector<1x8x128xf32>
    tpu.vector_store %arg9[%c2_29, %c0_30, %c0_31], %55 {strides = array<i32>} : memref<8x8x128xf32, #tpu.memory_space<vmem>>, vector<1x8x128xf32>,
    %c2_i32 = arith.constant 2 : i32
    %56 = vector.broadcast %c2_i32 : i32 to vector<1x32xi32>
    %57 = arith.muli %56, %5 : vector<1x32xi32>
    %c5_i32 = arith.constant 5 : i32
    %58 = vector.broadcast %c5_i32 : i32 to vector<1x32xi32>
    %59 = arith.muli %58, %3 : vector<1x32xi32>
    %60 = arith.addi %57, %59 : vector<1x32xi32>
    %61 = vector.broadcast %60 : vector<1x32xi32> to vector<8x32xi32>
    %62 = vector.broadcast %2 : vector<8x1xi32> to vector<8x32xi32>
    %63 = arith.cmpi slt, %61, %62 : vector<8x32xi32>
    %64 = arith.extui %63 : vector<8x32xi1> to vector<8x32xi32>
    %65 = arith.sitofp %64 : vector<8x32xi32> to vector<8x32xf32>
    %c2_32 = arith.constant 2 : index
    %c0_33 = arith.constant 0 : index
    %c0_34 = arith.constant 0 : index
    %66 = vector.load %arg10[%c2_32, %c0_33, %c0_34] : memref<8x8x32xf32, #tpu.memory_space<vmem>>, vector<1x8x32xf32>
    %67 = vector.shape_cast %66 : vector<1x8x32xf32> to vector<8x32xf32>
    %68 = vector.shape_cast %65 : vector<8x32xf32> to vector<1x8x32xf32>
    tpu.vector_store %arg10[%c2_32, %c0_33, %c0_34], %68 {strides = array<i32>} : memref<8x8x32xf32, #tpu.memory_space<vmem>>, vector<1x8x32xf32>,
    %c3 = arith.constant 3 : index
    %c0_35 = arith.constant 0 : index
    %c0_36 = arith.constant 0 : index
    %69 = vector.load %arg1[%c3, %c0_35, %c0_36] : memref<8x8x64xbf16, #tpu.memory_space<vmem>>, vector<1x8x64xbf16>
    %70 = vector.shape_cast %69 : vector<1x8x64xbf16> to vector<8x64xbf16>
    %cst_37 = arith.constant dense<0.000000e+00> : vector<8x128xf32>
    %71 = tpu.matmul %70, %0, %cst_37 {dimension_numbers = #tpu.dot_dimension_numbers<[1], [0], [0], [1], [0, 0, 1, 1], [], []>} : vector<8x64xbf16>, vector<64x128xbf16>, vector<8x128xf32> -> vector<8x128xf32>
    %72 = vector.broadcast %1 : vector<1x128xf32> to vector<8x128xf32>
    %73 = arith.addf %71, %72 : vector<8x128xf32>
    %c3_38 = arith.constant 3 : index
    %c0_39 = arith.constant 0 : index
    %c0_40 = arith.constant 0 : index
    %74 = vector.load %arg9[%c3_38, %c0_39, %c0_40] : memref<8x8x128xf32, #tpu.memory_space<vmem>>, vector<1x8x128xf32>
    %75 = vector.shape_cast %74 : vector<1x8x128xf32> to vector<8x128xf32>
    %76 = vector.shape_cast %73 : vector<8x128xf32> to vector<1x8x128xf32>
    tpu.vector_store %arg9[%c3_38, %c0_39, %c0_40], %76 {strides = array<i32>} : memref<8x8x128xf32, #tpu.memory_space<vmem>>, vector<1x8x128xf32>,
    %c3_i32 = arith.constant 3 : i32
    %77 = vector.broadcast %c3_i32 : i32 to vector<1x32xi32>
    %78 = arith.muli %77, %5 : vector<1x32xi32>
    %c4_i32 = arith.constant 4 : i32
    %79 = vector.broadcast %c4_i32 : i32 to vector<1x32xi32>
    %80 = arith.muli %79, %3 : vector<1x32xi32>
    %81 = arith.addi %78, %80 : vector<1x32xi32>
    %82 = vector.broadcast %81 : vector<1x32xi32> to vector<8x32xi32>
    %83 = vector.broadcast %2 : vector<8x1xi32> to vector<8x32xi32>
    %84 = arith.cmpi slt, %82, %83 : vector<8x32xi32>
    %85 = arith.extui %84 : vector<8x32xi1> to vector<8x32xi32>
    %86 = arith.sitofp %85 : vector<8x32xi32> to vector<8x32xf32>
    %c3_41 = arith.constant 3 : index
    %c0_42 = arith.constant 0 : index
    %c0_43 = arith.constant 0 : index
    %87 = vector.load %arg10[%c3_41, %c0_42, %c0_43] : memref<8x8x32xf32, #tpu.memory_space<vmem>>, vector<1x8x32xf32>
    %88 = vector.shape_cast %87 : vector<1x8x32xf32> to vector<8x32xf32>
    %89 = vector.shape_cast %86 : vector<8x32xf32> to vector<1x8x32xf32>
    tpu.vector_store %arg10[%c3_41, %c0_42, %c0_43], %89 {strides = array<i32>} : memref<8x8x32xf32, #tpu.memory_space<vmem>>, vector<1x8x32xf32>,
    %c4 = arith.constant 4 : index
    %c0_44 = arith.constant 0 : index
    %c0_45 = arith.constant 0 : index
    %90 = vector.load %arg1[%c4, %c0_44, %c0_45] : memref<8x8x64xbf16, #tpu.memory_space<vmem>>, vector<1x8x64xbf16>
    %91 = vector.shape_cast %90 : vector<1x8x64xbf16> to vector<8x64xbf16>
    %cst_46 = arith.constant dense<0.000000e+00> : vector<8x128xf32>
    %92 = tpu.matmul %91, %0, %cst_46 {dimension_numbers = #tpu.dot_dimension_numbers<[1], [0], [0], [1], [0, 0, 1, 1], [], []>} : vector<8x64xbf16>, vector<64x128xbf16>, vector<8x128xf32> -> vector<8x128xf32>
    %93 = vector.broadcast %1 : vector<1x128xf32> to vector<8x128xf32>
    %94 = arith.addf %92, %93 : vector<8x128xf32>
    %c4_47 = arith.constant 4 : index
    %c0_48 = arith.constant 0 : index
    %c0_49 = arith.constant 0 : index
    %95 = vector.load %arg9[%c4_47, %c0_48, %c0_49] : memref<8x8x128xf32, #tpu.memory_space<vmem>>, vector<1x8x128xf32>
    %96 = vector.shape_cast %95 : vector<1x8x128xf32> to vector<8x128xf32>
    %97 = vector.shape_cast %94 : vector<8x128xf32> to vector<1x8x128xf32>
    tpu.vector_store %arg9[%c4_47, %c0_48, %c0_49], %97 {strides = array<i32>} : memref<8x8x128xf32, #tpu.memory_space<vmem>>, vector<1x8x128xf32>,
    %c4_i32_50 = arith.constant 4 : i32
    %98 = vector.broadcast %c4_i32_50 : i32 to vector<1x32xi32>
    %99 = arith.muli %98, %5 : vector<1x32xi32>
    %c3_i32_51 = arith.constant 3 : i32
    %100 = vector.broadcast %c3_i32_51 : i32 to vector<1x32xi32>
    %101 = arith.muli %100, %3 : vector<1x32xi32>
    %102 = arith.addi %99, %101 : vector<1x32xi32>
    %103 = vector.broadcast %102 : vector<1x32xi32> to vector<8x32xi32>
    %104 = vector.broadcast %2 : vector<8x1xi32> to vector<8x32xi32>
    %105 = arith.cmpi slt, %103, %104 : vector<8x32xi32>
    %106 = arith.extui %105 : vector<8x32xi1> to vector<8x32xi32>
    %107 = arith.sitofp %106 : vector<8x32xi32> to vector<8x32xf32>
    %c4_52 = arith.constant 4 : index
    %c0_53 = arith.constant 0 : index
    %c0_54 = arith.constant 0 : index
    %108 = vector.load %arg10[%c4_52, %c0_53, %c0_54] : memref<8x8x32xf32, #tpu.memory_space<vmem>>, vector<1x8x32xf32>
    %109 = vector.shape_cast %108 : vector<1x8x32xf32> to vector<8x32xf32>
    %110 = vector.shape_cast %107 : vector<8x32xf32> to vector<1x8x32xf32>
    tpu.vector_store %arg10[%c4_52, %c0_53, %c0_54], %110 {strides = array<i32>} : memref<8x8x32xf32, #tpu.memory_space<vmem>>, vector<1x8x32xf32>,
    %c5 = arith.constant 5 : index
    %c0_55 = arith.constant 0 : index
    %c0_56 = arith.constant 0 : index
    %111 = vector.load %arg1[%c5, %c0_55, %c0_56] : memref<8x8x64xbf16, #tpu.memory_space<vmem>>, vector<1x8x64xbf16>
    %112 = vector.shape_cast %111 : vector<1x8x64xbf16> to vector<8x64xbf16>
    %cst_57 = arith.constant dense<0.000000e+00> : vector<8x128xf32>
    %113 = tpu.matmul %112, %0, %cst_57 {dimension_numbers = #tpu.dot_dimension_numbers<[1], [0], [0], [1], [0, 0, 1, 1], [], []>} : vector<8x64xbf16>, vector<64x128xbf16>, vector<8x128xf32> -> vector<8x128xf32>
    %114 = vector.broadcast %1 : vector<1x128xf32> to vector<8x128xf32>
    %115 = arith.addf %113, %114 : vector<8x128xf32>
    %c5_58 = arith.constant 5 : index
    %c0_59 = arith.constant 0 : index
    %c0_60 = arith.constant 0 : index
    %116 = vector.load %arg9[%c5_58, %c0_59, %c0_60] : memref<8x8x128xf32, #tpu.memory_space<vmem>>, vector<1x8x128xf32>
    %117 = vector.shape_cast %116 : vector<1x8x128xf32> to vector<8x128xf32>
    %118 = vector.shape_cast %115 : vector<8x128xf32> to vector<1x8x128xf32>
    tpu.vector_store %arg9[%c5_58, %c0_59, %c0_60], %118 {strides = array<i32>} : memref<8x8x128xf32, #tpu.memory_space<vmem>>, vector<1x8x128xf32>,
    %c5_i32_61 = arith.constant 5 : i32
    %119 = vector.broadcast %c5_i32_61 : i32 to vector<1x32xi32>
    %120 = arith.muli %119, %5 : vector<1x32xi32>
    %c2_i32_62 = arith.constant 2 : i32
    %121 = vector.broadcast %c2_i32_62 : i32 to vector<1x32xi32>
    %122 = arith.muli %121, %3 : vector<1x32xi32>
    %123 = arith.addi %120, %122 : vector<1x32xi32>
    %124 = vector.broadcast %123 : vector<1x32xi32> to vector<8x32xi32>
    %125 = vector.broadcast %2 : vector<8x1xi32> to vector<8x32xi32>
    %126 = arith.cmpi slt, %124, %125 : vector<8x32xi32>
    %127 = arith.extui %126 : vector<8x32xi1> to vector<8x32xi32>
    %128 = arith.sitofp %127 : vector<8x32xi32> to vector<8x32xf32>
    %c5_63 = arith.constant 5 : index
    %c0_64 = arith.constant 0 : index
    %c0_65 = arith.constant 0 : index
    %129 = vector.load %arg10[%c5_63, %c0_64, %c0_65] : memref<8x8x32xf32, #tpu.memory_space<vmem>>, vector<1x8x32xf32>
    %130 = vector.shape_cast %129 : vector<1x8x32xf32> to vector<8x32xf32>
    %131 = vector.shape_cast %128 : vector<8x32xf32> to vector<1x8x32xf32>
    tpu.vector_store %arg10[%c5_63, %c0_64, %c0_65], %131 {strides = array<i32>} : memref<8x8x32xf32, #tpu.memory_space<vmem>>, vector<1x8x32xf32>,
    %c6 = arith.constant 6 : index
    %c0_66 = arith.constant 0 : index
    %c0_67 = arith.constant 0 : index
    %132 = vector.load %arg1[%c6, %c0_66, %c0_67] : memref<8x8x64xbf16, #tpu.memory_space<vmem>>, vector<1x8x64xbf16>
    %133 = vector.shape_cast %132 : vector<1x8x64xbf16> to vector<8x64xbf16>
    %cst_68 = arith.constant dense<0.000000e+00> : vector<8x128xf32>
    %134 = tpu.matmul %133, %0, %cst_68 {dimension_numbers = #tpu.dot_dimension_numbers<[1], [0], [0], [1], [0, 0, 1, 1], [], []>} : vector<8x64xbf16>, vector<64x128xbf16>, vector<8x128xf32> -> vector<8x128xf32>
    %135 = vector.broadcast %1 : vector<1x128xf32> to vector<8x128xf32>
    %136 = arith.addf %134, %135 : vector<8x128xf32>
    %c6_69 = arith.constant 6 : index
    %c0_70 = arith.constant 0 : index
    %c0_71 = arith.constant 0 : index
    %137 = vector.load %arg9[%c6_69, %c0_70, %c0_71] : memref<8x8x128xf32, #tpu.memory_space<vmem>>, vector<1x8x128xf32>
    %138 = vector.shape_cast %137 : vector<1x8x128xf32> to vector<8x128xf32>
    %139 = vector.shape_cast %136 : vector<8x128xf32> to vector<1x8x128xf32>
    tpu.vector_store %arg9[%c6_69, %c0_70, %c0_71], %139 {strides = array<i32>} : memref<8x8x128xf32, #tpu.memory_space<vmem>>, vector<1x8x128xf32>,
    %c6_i32_72 = arith.constant 6 : i32
    %140 = vector.broadcast %c6_i32_72 : i32 to vector<1x32xi32>
    %141 = arith.muli %140, %5 : vector<1x32xi32>
    %c1_i32_73 = arith.constant 1 : i32
    %142 = vector.broadcast %c1_i32_73 : i32 to vector<1x32xi32>
    %143 = arith.muli %142, %3 : vector<1x32xi32>
    %144 = arith.addi %141, %143 : vector<1x32xi32>
    %145 = vector.broadcast %144 : vector<1x32xi32> to vector<8x32xi32>
    %146 = vector.broadcast %2 : vector<8x1xi32> to vector<8x32xi32>
    %147 = arith.cmpi slt, %145, %146 : vector<8x32xi32>
    %148 = arith.extui %147 : vector<8x32xi1> to vector<8x32xi32>
    %149 = arith.sitofp %148 : vector<8x32xi32> to vector<8x32xf32>
    %c6_74 = arith.constant 6 : index
    %c0_75 = arith.constant 0 : index
    %c0_76 = arith.constant 0 : index
    %150 = vector.load %arg10[%c6_74, %c0_75, %c0_76] : memref<8x8x32xf32, #tpu.memory_space<vmem>>, vector<1x8x32xf32>
    %151 = vector.shape_cast %150 : vector<1x8x32xf32> to vector<8x32xf32>
    %152 = vector.shape_cast %149 : vector<8x32xf32> to vector<1x8x32xf32>
    tpu.vector_store %arg10[%c6_74, %c0_75, %c0_76], %152 {strides = array<i32>} : memref<8x8x32xf32, #tpu.memory_space<vmem>>, vector<1x8x32xf32>,
    %c7 = arith.constant 7 : index
    %c0_77 = arith.constant 0 : index
    %c0_78 = arith.constant 0 : index
    %153 = vector.load %arg1[%c7, %c0_77, %c0_78] : memref<8x8x64xbf16, #tpu.memory_space<vmem>>, vector<1x8x64xbf16>
    %154 = vector.shape_cast %153 : vector<1x8x64xbf16> to vector<8x64xbf16>
    %cst_79 = arith.constant dense<0.000000e+00> : vector<8x128xf32>
    %155 = tpu.matmul %154, %0, %cst_79 {dimension_numbers = #tpu.dot_dimension_numbers<[1], [0], [0], [1], [0, 0, 1, 1], [], []>} : vector<8x64xbf16>, vector<64x128xbf16>, vector<8x128xf32> -> vector<8x128xf32>
    %156 = vector.broadcast %1 : vector<1x128xf32> to vector<8x128xf32>
    %157 = arith.addf %155, %156 : vector<8x128xf32>
    %c7_80 = arith.constant 7 : index
    %c0_81 = arith.constant 0 : index
    %c0_82 = arith.constant 0 : index
    %158 = vector.load %arg9[%c7_80, %c0_81, %c0_82] : memref<8x8x128xf32, #tpu.memory_space<vmem>>, vector<1x8x128xf32>
    %159 = vector.shape_cast %158 : vector<1x8x128xf32> to vector<8x128xf32>
    %160 = vector.shape_cast %157 : vector<8x128xf32> to vector<1x8x128xf32>
    tpu.vector_store %arg9[%c7_80, %c0_81, %c0_82], %160 {strides = array<i32>} : memref<8x8x128xf32, #tpu.memory_space<vmem>>, vector<1x8x128xf32>,
    %c7_i32_83 = arith.constant 7 : i32
    %161 = vector.broadcast %c7_i32_83 : i32 to vector<1x32xi32>
    %162 = arith.muli %161, %5 : vector<1x32xi32>
    %c0_i32_84 = arith.constant 0 : i32
    %163 = vector.broadcast %c0_i32_84 : i32 to vector<1x32xi32>
    %164 = arith.muli %163, %3 : vector<1x32xi32>
    %165 = arith.addi %162, %164 : vector<1x32xi32>
    %166 = vector.broadcast %165 : vector<1x32xi32> to vector<8x32xi32>
    %167 = vector.broadcast %2 : vector<8x1xi32> to vector<8x32xi32>
    %168 = arith.cmpi slt, %166, %167 : vector<8x32xi32>
    %169 = arith.extui %168 : vector<8x32xi1> to vector<8x32xi32>
    %170 = arith.sitofp %169 : vector<8x32xi32> to vector<8x32xf32>
    %c7_85 = arith.constant 7 : index
    %c0_86 = arith.constant 0 : index
    %c0_87 = arith.constant 0 : index
    %171 = vector.load %arg10[%c7_85, %c0_86, %c0_87] : memref<8x8x32xf32, #tpu.memory_space<vmem>>, vector<1x8x32xf32>
    %172 = vector.shape_cast %171 : vector<1x8x32xf32> to vector<8x32xf32>
    %173 = vector.shape_cast %170 : vector<8x32xf32> to vector<1x8x32xf32>
    tpu.vector_store %arg10[%c7_85, %c0_86, %c0_87], %173 {strides = array<i32>} : memref<8x8x32xf32, #tpu.memory_space<vmem>>, vector<1x8x32xf32>,
    %c0_88 = arith.constant 0 : index
    %c0_89 = arith.constant 0 : index
    %174 = vector.load %arg5[%c0_88, %c0_89] : memref<32x128xf32, #tpu.memory_space<vmem>>, vector<32x128xf32>
    %c0_90 = arith.constant 0 : index
    %c0_91 = arith.constant 0 : index
    %175 = vector.load %arg7[%c0_90, %c0_91] : memref<8x32xf32, #tpu.memory_space<vmem>>, vector<8x32xf32>
    %cst_92 = arith.constant 0.000000e+00 : f32
    %176 = vector.broadcast %cst_92 : f32 to vector<8x32xf32>
    %c0_i32_93 = arith.constant 0 : i32
    %177 = arith.index_cast %c0_i32_93 : i32 to index
    %c0_94 = arith.constant 0 : index
    %c0_95 = arith.constant 0 : index
    %178 = vector.load %arg9[%177, %c0_94, %c0_95] : memref<8x8x128xf32, #tpu.memory_space<vmem>>, vector<1x8x128xf32>
    %179 = vector.shape_cast %178 : vector<1x8x128xf32> to vector<8x128xf32>
    %cst_96 = arith.constant dense<0.000000e+00> : vector<8x128xf32>
    %180 = tpu.matmul %175, %174, %cst_96 {dimension_numbers = #tpu.dot_dimension_numbers<[1], [0], [0], [1], [0, 0, 1, 1], [], []>} : vector<8x32xf32>, vector<32x128xf32>, vector<8x128xf32> -> vector<8x128xf32>
    %181 = arith.addf %179, %180 : vector<8x128xf32>
    %cst_97 = arith.constant 5.000000e-01 : f32
    %182 = vector.broadcast %cst_97 : f32 to vector<8x128xf32>
    %183 = arith.mulf %182, %181 : vector<8x128xf32>
    %184 = math.tanh %183 : vector<8x128xf32>
    %cst_98 = arith.constant 5.000000e-01 : f32
    %185 = vector.broadcast %cst_98 : f32 to vector<8x128xf32>
    %186 = arith.mulf %185, %184 : vector<8x128xf32>
    %cst_99 = arith.constant 5.000000e-01 : f32
    %187 = vector.broadcast %cst_99 : f32 to vector<8x128xf32>
    %188 = arith.addf %186, %187 : vector<8x128xf32>
    %189 = vector.extract_strided_slice %188 {offsets = [0, 0], sizes = [8, 32], strides = [1, 1]} : vector<8x128xf32> to vector<8x32xf32>
    %190 = vector.extract_strided_slice %188 {offsets = [0, 32], sizes = [8, 32], strides = [1, 1]} : vector<8x128xf32> to vector<8x32xf32>
    %191 = vector.extract_strided_slice %188 {offsets = [0, 96], sizes = [8, 32], strides = [1, 1]} : vector<8x128xf32> to vector<8x32xf32>
    %192 = vector.extract_strided_slice %181 {offsets = [0, 64], sizes = [8, 32], strides = [1, 1]} : vector<8x128xf32> to vector<8x32xf32>
    %193 = math.tanh %192 : vector<8x32xf32>
    %194 = arith.mulf %190, %176 : vector<8x32xf32>
    %195 = arith.mulf %189, %193 : vector<8x32xf32>
    %196 = arith.addf %194, %195 : vector<8x32xf32>
    %197 = math.tanh %196 : vector<8x32xf32>
    %198 = arith.mulf %191, %197 : vector<8x32xf32>
    %199 = arith.index_cast %c0_i32_93 : i32 to index
    %c0_100 = arith.constant 0 : index
    %c0_101 = arith.constant 0 : index
    %200 = vector.load %arg10[%199, %c0_100, %c0_101] : memref<8x8x32xf32, #tpu.memory_space<vmem>>, vector<1x8x32xf32>
    %201 = vector.shape_cast %200 : vector<1x8x32xf32> to vector<8x32xf32>
    %202 = arith.subf %198, %175 : vector<8x32xf32>
    %203 = arith.mulf %201, %202 : vector<8x32xf32>
    %204 = arith.addf %175, %203 : vector<8x32xf32>
    %205 = arith.subf %196, %176 : vector<8x32xf32>
    %206 = arith.mulf %201, %205 : vector<8x32xf32>
    %207 = arith.addf %176, %206 : vector<8x32xf32>
    %c1_i32_102 = arith.constant 1 : i32
    %208 = arith.index_cast %c1_i32_102 : i32 to index
    %c0_103 = arith.constant 0 : index
    %c0_104 = arith.constant 0 : index
    %209 = vector.load %arg9[%208, %c0_103, %c0_104] : memref<8x8x128xf32, #tpu.memory_space<vmem>>, vector<1x8x128xf32>
    %210 = vector.shape_cast %209 : vector<1x8x128xf32> to vector<8x128xf32>
    %cst_105 = arith.constant dense<0.000000e+00> : vector<8x128xf32>
    %211 = tpu.matmul %204, %174, %cst_105 {dimension_numbers = #tpu.dot_dimension_numbers<[1], [0], [0], [1], [0, 0, 1, 1], [], []>} : vector<8x32xf32>, vector<32x128xf32>, vector<8x128xf32> -> vector<8x128xf32>
    %212 = arith.addf %210, %211 : vector<8x128xf32>
    %cst_106 = arith.constant 5.000000e-01 : f32
    %213 = vector.broadcast %cst_106 : f32 to vector<8x128xf32>
    %214 = arith.mulf %213, %212 : vector<8x128xf32>
    %215 = math.tanh %214 : vector<8x128xf32>
    %cst_107 = arith.constant 5.000000e-01 : f32
    %216 = vector.broadcast %cst_107 : f32 to vector<8x128xf32>
    %217 = arith.mulf %216, %215 : vector<8x128xf32>
    %cst_108 = arith.constant 5.000000e-01 : f32
    %218 = vector.broadcast %cst_108 : f32 to vector<8x128xf32>
    %219 = arith.addf %217, %218 : vector<8x128xf32>
    %220 = vector.extract_strided_slice %219 {offsets = [0, 0], sizes = [8, 32], strides = [1, 1]} : vector<8x128xf32> to vector<8x32xf32>
    %221 = vector.extract_strided_slice %219 {offsets = [0, 32], sizes = [8, 32], strides = [1, 1]} : vector<8x128xf32> to vector<8x32xf32>
    %222 = vector.extract_strided_slice %219 {offsets = [0, 96], sizes = [8, 32], strides = [1, 1]} : vector<8x128xf32> to vector<8x32xf32>
    %223 = vector.extract_strided_slice %212 {offsets = [0, 64], sizes = [8, 32], strides = [1, 1]} : vector<8x128xf32> to vector<8x32xf32>
    %224 = math.tanh %223 : vector<8x32xf32>
    %225 = arith.mulf %221, %207 : vector<8x32xf32>
    %226 = arith.mulf %220, %224 : vector<8x32xf32>
    %227 = arith.addf %225, %226 : vector<8x32xf32>
    %228 = math.tanh %227 : vector<8x32xf32>
    %229 = arith.mulf %222, %228 : vector<8x32xf32>
    %230 = arith.index_cast %c1_i32_102 : i32 to index
    %c0_109 = arith.constant 0 : index
    %c0_110 = arith.constant 0 : index
    %231 = vector.load %arg10[%230, %c0_109, %c0_110] : memref<8x8x32xf32, #tpu.memory_space<vmem>>, vector<1x8x32xf32>
    %232 = vector.shape_cast %231 : vector<1x8x32xf32> to vector<8x32xf32>
    %233 = arith.subf %229, %204 : vector<8x32xf32>
    %234 = arith.mulf %232, %233 : vector<8x32xf32>
    %235 = arith.addf %204, %234 : vector<8x32xf32>
    %236 = arith.subf %227, %207 : vector<8x32xf32>
    %237 = arith.mulf %232, %236 : vector<8x32xf32>
    %238 = arith.addf %207, %237 : vector<8x32xf32>
    %c2_i32_111 = arith.constant 2 : i32
    %239 = arith.index_cast %c2_i32_111 : i32 to index
    %c0_112 = arith.constant 0 : index
    %c0_113 = arith.constant 0 : index
    %240 = vector.load %arg9[%239, %c0_112, %c0_113] : memref<8x8x128xf32, #tpu.memory_space<vmem>>, vector<1x8x128xf32>
    %241 = vector.shape_cast %240 : vector<1x8x128xf32> to vector<8x128xf32>
    %cst_114 = arith.constant dense<0.000000e+00> : vector<8x128xf32>
    %242 = tpu.matmul %235, %174, %cst_114 {dimension_numbers = #tpu.dot_dimension_numbers<[1], [0], [0], [1], [0, 0, 1, 1], [], []>} : vector<8x32xf32>, vector<32x128xf32>, vector<8x128xf32> -> vector<8x128xf32>
    %243 = arith.addf %241, %242 : vector<8x128xf32>
    %cst_115 = arith.constant 5.000000e-01 : f32
    %244 = vector.broadcast %cst_115 : f32 to vector<8x128xf32>
    %245 = arith.mulf %244, %243 : vector<8x128xf32>
    %246 = math.tanh %245 : vector<8x128xf32>
    %cst_116 = arith.constant 5.000000e-01 : f32
    %247 = vector.broadcast %cst_116 : f32 to vector<8x128xf32>
    %248 = arith.mulf %247, %246 : vector<8x128xf32>
    %cst_117 = arith.constant 5.000000e-01 : f32
    %249 = vector.broadcast %cst_117 : f32 to vector<8x128xf32>
    %250 = arith.addf %248, %249 : vector<8x128xf32>
    %251 = vector.extract_strided_slice %250 {offsets = [0, 0], sizes = [8, 32], strides = [1, 1]} : vector<8x128xf32> to vector<8x32xf32>
    %252 = vector.extract_strided_slice %250 {offsets = [0, 32], sizes = [8, 32], strides = [1, 1]} : vector<8x128xf32> to vector<8x32xf32>
    %253 = vector.extract_strided_slice %250 {offsets = [0, 96], sizes = [8, 32], strides = [1, 1]} : vector<8x128xf32> to vector<8x32xf32>
    %254 = vector.extract_strided_slice %243 {offsets = [0, 64], sizes = [8, 32], strides = [1, 1]} : vector<8x128xf32> to vector<8x32xf32>
    %255 = math.tanh %254 : vector<8x32xf32>
    %256 = arith.mulf %252, %238 : vector<8x32xf32>
    %257 = arith.mulf %251, %255 : vector<8x32xf32>
    %258 = arith.addf %256, %257 : vector<8x32xf32>
    %259 = math.tanh %258 : vector<8x32xf32>
    %260 = arith.mulf %253, %259 : vector<8x32xf32>
    %261 = arith.index_cast %c2_i32_111 : i32 to index
    %c0_118 = arith.constant 0 : index
    %c0_119 = arith.constant 0 : index
    %262 = vector.load %arg10[%261, %c0_118, %c0_119] : memref<8x8x32xf32, #tpu.memory_space<vmem>>, vector<1x8x32xf32>
    %263 = vector.shape_cast %262 : vector<1x8x32xf32> to vector<8x32xf32>
    %264 = arith.subf %260, %235 : vector<8x32xf32>
    %265 = arith.mulf %263, %264 : vector<8x32xf32>
    %266 = arith.addf %235, %265 : vector<8x32xf32>
    %267 = arith.subf %258, %238 : vector<8x32xf32>
    %268 = arith.mulf %263, %267 : vector<8x32xf32>
    %269 = arith.addf %238, %268 : vector<8x32xf32>
    %c3_i32_120 = arith.constant 3 : i32
    %270 = arith.index_cast %c3_i32_120 : i32 to index
    %c0_121 = arith.constant 0 : index
    %c0_122 = arith.constant 0 : index
    %271 = vector.load %arg9[%270, %c0_121, %c0_122] : memref<8x8x128xf32, #tpu.memory_space<vmem>>, vector<1x8x128xf32>
    %272 = vector.shape_cast %271 : vector<1x8x128xf32> to vector<8x128xf32>
    %cst_123 = arith.constant dense<0.000000e+00> : vector<8x128xf32>
    %273 = tpu.matmul %266, %174, %cst_123 {dimension_numbers = #tpu.dot_dimension_numbers<[1], [0], [0], [1], [0, 0, 1, 1], [], []>} : vector<8x32xf32>, vector<32x128xf32>, vector<8x128xf32> -> vector<8x128xf32>
    %274 = arith.addf %272, %273 : vector<8x128xf32>
    %cst_124 = arith.constant 5.000000e-01 : f32
    %275 = vector.broadcast %cst_124 : f32 to vector<8x128xf32>
    %276 = arith.mulf %275, %274 : vector<8x128xf32>
    %277 = math.tanh %276 : vector<8x128xf32>
    %cst_125 = arith.constant 5.000000e-01 : f32
    %278 = vector.broadcast %cst_125 : f32 to vector<8x128xf32>
    %279 = arith.mulf %278, %277 : vector<8x128xf32>
    %cst_126 = arith.constant 5.000000e-01 : f32
    %280 = vector.broadcast %cst_126 : f32 to vector<8x128xf32>
    %281 = arith.addf %279, %280 : vector<8x128xf32>
    %282 = vector.extract_strided_slice %281 {offsets = [0, 0], sizes = [8, 32], strides = [1, 1]} : vector<8x128xf32> to vector<8x32xf32>
    %283 = vector.extract_strided_slice %281 {offsets = [0, 32], sizes = [8, 32], strides = [1, 1]} : vector<8x128xf32> to vector<8x32xf32>
    %284 = vector.extract_strided_slice %281 {offsets = [0, 96], sizes = [8, 32], strides = [1, 1]} : vector<8x128xf32> to vector<8x32xf32>
    %285 = vector.extract_strided_slice %274 {offsets = [0, 64], sizes = [8, 32], strides = [1, 1]} : vector<8x128xf32> to vector<8x32xf32>
    %286 = math.tanh %285 : vector<8x32xf32>
    %287 = arith.mulf %283, %269 : vector<8x32xf32>
    %288 = arith.mulf %282, %286 : vector<8x32xf32>
    %289 = arith.addf %287, %288 : vector<8x32xf32>
    %290 = math.tanh %289 : vector<8x32xf32>
    %291 = arith.mulf %284, %290 : vector<8x32xf32>
    %292 = arith.index_cast %c3_i32_120 : i32 to index
    %c0_127 = arith.constant 0 : index
    %c0_128 = arith.constant 0 : index
    %293 = vector.load %arg10[%292, %c0_127, %c0_128] : memref<8x8x32xf32, #tpu.memory_space<vmem>>, vector<1x8x32xf32>
    %294 = vector.shape_cast %293 : vector<1x8x32xf32> to vector<8x32xf32>
    %295 = arith.subf %291, %266 : vector<8x32xf32>
    %296 = arith.mulf %294, %295 : vector<8x32xf32>
    %297 = arith.addf %266, %296 : vector<8x32xf32>
    %298 = arith.subf %289, %269 : vector<8x32xf32>
    %299 = arith.mulf %294, %298 : vector<8x32xf32>
    %300 = arith.addf %269, %299 : vector<8x32xf32>
    %c4_i32_129 = arith.constant 4 : i32
    %301 = arith.index_cast %c4_i32_129 : i32 to index
    %c0_130 = arith.constant 0 : index
    %c0_131 = arith.constant 0 : index
    %302 = vector.load %arg9[%301, %c0_130, %c0_131] : memref<8x8x128xf32, #tpu.memory_space<vmem>>, vector<1x8x128xf32>
    %303 = vector.shape_cast %302 : vector<1x8x128xf32> to vector<8x128xf32>
    %cst_132 = arith.constant dense<0.000000e+00> : vector<8x128xf32>
    %304 = tpu.matmul %297, %174, %cst_132 {dimension_numbers = #tpu.dot_dimension_numbers<[1], [0], [0], [1], [0, 0, 1, 1], [], []>} : vector<8x32xf32>, vector<32x128xf32>, vector<8x128xf32> -> vector<8x128xf32>
    %305 = arith.addf %303, %304 : vector<8x128xf32>
    %cst_133 = arith.constant 5.000000e-01 : f32
    %306 = vector.broadcast %cst_133 : f32 to vector<8x128xf32>
    %307 = arith.mulf %306, %305 : vector<8x128xf32>
    %308 = math.tanh %307 : vector<8x128xf32>
    %cst_134 = arith.constant 5.000000e-01 : f32
    %309 = vector.broadcast %cst_134 : f32 to vector<8x128xf32>
    %310 = arith.mulf %309, %308 : vector<8x128xf32>
    %cst_135 = arith.constant 5.000000e-01 : f32
    %311 = vector.broadcast %cst_135 : f32 to vector<8x128xf32>
    %312 = arith.addf %310, %311 : vector<8x128xf32>
    %313 = vector.extract_strided_slice %312 {offsets = [0, 0], sizes = [8, 32], strides = [1, 1]} : vector<8x128xf32> to vector<8x32xf32>
    %314 = vector.extract_strided_slice %312 {offsets = [0, 32], sizes = [8, 32], strides = [1, 1]} : vector<8x128xf32> to vector<8x32xf32>
    %315 = vector.extract_strided_slice %312 {offsets = [0, 96], sizes = [8, 32], strides = [1, 1]} : vector<8x128xf32> to vector<8x32xf32>
    %316 = vector.extract_strided_slice %305 {offsets = [0, 64], sizes = [8, 32], strides = [1, 1]} : vector<8x128xf32> to vector<8x32xf32>
    %317 = math.tanh %316 : vector<8x32xf32>
    %318 = arith.mulf %314, %300 : vector<8x32xf32>
    %319 = arith.mulf %313, %317 : vector<8x32xf32>
    %320 = arith.addf %318, %319 : vector<8x32xf32>
    %321 = math.tanh %320 : vector<8x32xf32>
    %322 = arith.mulf %315, %321 : vector<8x32xf32>
    %323 = arith.index_cast %c4_i32_129 : i32 to index
    %c0_136 = arith.constant 0 : index
    %c0_137 = arith.constant 0 : index
    %324 = vector.load %arg10[%323, %c0_136, %c0_137] : memref<8x8x32xf32, #tpu.memory_space<vmem>>, vector<1x8x32xf32>
    %325 = vector.shape_cast %324 : vector<1x8x32xf32> to vector<8x32xf32>
    %326 = arith.subf %322, %297 : vector<8x32xf32>
    %327 = arith.mulf %325, %326 : vector<8x32xf32>
    %328 = arith.addf %297, %327 : vector<8x32xf32>
    %329 = arith.subf %320, %300 : vector<8x32xf32>
    %330 = arith.mulf %325, %329 : vector<8x32xf32>
    %331 = arith.addf %300, %330 : vector<8x32xf32>
    %c5_i32_138 = arith.constant 5 : i32
    %332 = arith.index_cast %c5_i32_138 : i32 to index
    %c0_139 = arith.constant 0 : index
    %c0_140 = arith.constant 0 : index
    %333 = vector.load %arg9[%332, %c0_139, %c0_140] : memref<8x8x128xf32, #tpu.memory_space<vmem>>, vector<1x8x128xf32>
    %334 = vector.shape_cast %333 : vector<1x8x128xf32> to vector<8x128xf32>
    %cst_141 = arith.constant dense<0.000000e+00> : vector<8x128xf32>
    %335 = tpu.matmul %328, %174, %cst_141 {dimension_numbers = #tpu.dot_dimension_numbers<[1], [0], [0], [1], [0, 0, 1, 1], [], []>} : vector<8x32xf32>, vector<32x128xf32>, vector<8x128xf32> -> vector<8x128xf32>
    %336 = arith.addf %334, %335 : vector<8x128xf32>
    %cst_142 = arith.constant 5.000000e-01 : f32
    %337 = vector.broadcast %cst_142 : f32 to vector<8x128xf32>
    %338 = arith.mulf %337, %336 : vector<8x128xf32>
    %339 = math.tanh %338 : vector<8x128xf32>
    %cst_143 = arith.constant 5.000000e-01 : f32
    %340 = vector.broadcast %cst_143 : f32 to vector<8x128xf32>
    %341 = arith.mulf %340, %339 : vector<8x128xf32>
    %cst_144 = arith.constant 5.000000e-01 : f32
    %342 = vector.broadcast %cst_144 : f32 to vector<8x128xf32>
    %343 = arith.addf %341, %342 : vector<8x128xf32>
    %344 = vector.extract_strided_slice %343 {offsets = [0, 0], sizes = [8, 32], strides = [1, 1]} : vector<8x128xf32> to vector<8x32xf32>
    %345 = vector.extract_strided_slice %343 {offsets = [0, 32], sizes = [8, 32], strides = [1, 1]} : vector<8x128xf32> to vector<8x32xf32>
    %346 = vector.extract_strided_slice %343 {offsets = [0, 96], sizes = [8, 32], strides = [1, 1]} : vector<8x128xf32> to vector<8x32xf32>
    %347 = vector.extract_strided_slice %336 {offsets = [0, 64], sizes = [8, 32], strides = [1, 1]} : vector<8x128xf32> to vector<8x32xf32>
    %348 = math.tanh %347 : vector<8x32xf32>
    %349 = arith.mulf %345, %331 : vector<8x32xf32>
    %350 = arith.mulf %344, %348 : vector<8x32xf32>
    %351 = arith.addf %349, %350 : vector<8x32xf32>
    %352 = math.tanh %351 : vector<8x32xf32>
    %353 = arith.mulf %346, %352 : vector<8x32xf32>
    %354 = arith.index_cast %c5_i32_138 : i32 to index
    %c0_145 = arith.constant 0 : index
    %c0_146 = arith.constant 0 : index
    %355 = vector.load %arg10[%354, %c0_145, %c0_146] : memref<8x8x32xf32, #tpu.memory_space<vmem>>, vector<1x8x32xf32>
    %356 = vector.shape_cast %355 : vector<1x8x32xf32> to vector<8x32xf32>
    %357 = arith.subf %353, %328 : vector<8x32xf32>
    %358 = arith.mulf %356, %357 : vector<8x32xf32>
    %359 = arith.addf %328, %358 : vector<8x32xf32>
    %360 = arith.subf %351, %331 : vector<8x32xf32>
    %361 = arith.mulf %356, %360 : vector<8x32xf32>
    %362 = arith.addf %331, %361 : vector<8x32xf32>
    %c6_i32_147 = arith.constant 6 : i32
    %363 = arith.index_cast %c6_i32_147 : i32 to index
    %c0_148 = arith.constant 0 : index
    %c0_149 = arith.constant 0 : index
    %364 = vector.load %arg9[%363, %c0_148, %c0_149] : memref<8x8x128xf32, #tpu.memory_space<vmem>>, vector<1x8x128xf32>
    %365 = vector.shape_cast %364 : vector<1x8x128xf32> to vector<8x128xf32>
    %cst_150 = arith.constant dense<0.000000e+00> : vector<8x128xf32>
    %366 = tpu.matmul %359, %174, %cst_150 {dimension_numbers = #tpu.dot_dimension_numbers<[1], [0], [0], [1], [0, 0, 1, 1], [], []>} : vector<8x32xf32>, vector<32x128xf32>, vector<8x128xf32> -> vector<8x128xf32>
    %367 = arith.addf %365, %366 : vector<8x128xf32>
    %cst_151 = arith.constant 5.000000e-01 : f32
    %368 = vector.broadcast %cst_151 : f32 to vector<8x128xf32>
    %369 = arith.mulf %368, %367 : vector<8x128xf32>
    %370 = math.tanh %369 : vector<8x128xf32>
    %cst_152 = arith.constant 5.000000e-01 : f32
    %371 = vector.broadcast %cst_152 : f32 to vector<8x128xf32>
    %372 = arith.mulf %371, %370 : vector<8x128xf32>
    %cst_153 = arith.constant 5.000000e-01 : f32
    %373 = vector.broadcast %cst_153 : f32 to vector<8x128xf32>
    %374 = arith.addf %372, %373 : vector<8x128xf32>
    %375 = vector.extract_strided_slice %374 {offsets = [0, 0], sizes = [8, 32], strides = [1, 1]} : vector<8x128xf32> to vector<8x32xf32>
    %376 = vector.extract_strided_slice %374 {offsets = [0, 32], sizes = [8, 32], strides = [1, 1]} : vector<8x128xf32> to vector<8x32xf32>
    %377 = vector.extract_strided_slice %374 {offsets = [0, 96], sizes = [8, 32], strides = [1, 1]} : vector<8x128xf32> to vector<8x32xf32>
    %378 = vector.extract_strided_slice %367 {offsets = [0, 64], sizes = [8, 32], strides = [1, 1]} : vector<8x128xf32> to vector<8x32xf32>
    %379 = math.tanh %378 : vector<8x32xf32>
    %380 = arith.mulf %376, %362 : vector<8x32xf32>
    %381 = arith.mulf %375, %379 : vector<8x32xf32>
    %382 = arith.addf %380, %381 : vector<8x32xf32>
    %383 = math.tanh %382 : vector<8x32xf32>
    %384 = arith.mulf %377, %383 : vector<8x32xf32>
    %385 = arith.index_cast %c6_i32_147 : i32 to index
    %c0_154 = arith.constant 0 : index
    %c0_155 = arith.constant 0 : index
    %386 = vector.load %arg10[%385, %c0_154, %c0_155] : memref<8x8x32xf32, #tpu.memory_space<vmem>>, vector<1x8x32xf32>
    %387 = vector.shape_cast %386 : vector<1x8x32xf32> to vector<8x32xf32>
    %388 = arith.subf %384, %359 : vector<8x32xf32>
    %389 = arith.mulf %387, %388 : vector<8x32xf32>
    %390 = arith.addf %359, %389 : vector<8x32xf32>
    %391 = arith.subf %382, %362 : vector<8x32xf32>
    %392 = arith.mulf %387, %391 : vector<8x32xf32>
    %393 = arith.addf %362, %392 : vector<8x32xf32>
    %c7_i32_156 = arith.constant 7 : i32
    %394 = arith.index_cast %c7_i32_156 : i32 to index
    %c0_157 = arith.constant 0 : index
    %c0_158 = arith.constant 0 : index
    %395 = vector.load %arg9[%394, %c0_157, %c0_158] : memref<8x8x128xf32, #tpu.memory_space<vmem>>, vector<1x8x128xf32>
    %396 = vector.shape_cast %395 : vector<1x8x128xf32> to vector<8x128xf32>
    %cst_159 = arith.constant dense<0.000000e+00> : vector<8x128xf32>
    %397 = tpu.matmul %390, %174, %cst_159 {dimension_numbers = #tpu.dot_dimension_numbers<[1], [0], [0], [1], [0, 0, 1, 1], [], []>} : vector<8x32xf32>, vector<32x128xf32>, vector<8x128xf32> -> vector<8x128xf32>
    %398 = arith.addf %396, %397 : vector<8x128xf32>
    %cst_160 = arith.constant 5.000000e-01 : f32
    %399 = vector.broadcast %cst_160 : f32 to vector<8x128xf32>
    %400 = arith.mulf %399, %398 : vector<8x128xf32>
    %401 = math.tanh %400 : vector<8x128xf32>
    %cst_161 = arith.constant 5.000000e-01 : f32
    %402 = vector.broadcast %cst_161 : f32 to vector<8x128xf32>
    %403 = arith.mulf %402, %401 : vector<8x128xf32>
    %cst_162 = arith.constant 5.000000e-01 : f32
    %404 = vector.broadcast %cst_162 : f32 to vector<8x128xf32>
    %405 = arith.addf %403, %404 : vector<8x128xf32>
    %406 = vector.extract_strided_slice %405 {offsets = [0, 0], sizes = [8, 32], strides = [1, 1]} : vector<8x128xf32> to vector<8x32xf32>
    %407 = vector.extract_strided_slice %405 {offsets = [0, 32], sizes = [8, 32], strides = [1, 1]} : vector<8x128xf32> to vector<8x32xf32>
    %408 = vector.extract_strided_slice %405 {offsets = [0, 96], sizes = [8, 32], strides = [1, 1]} : vector<8x128xf32> to vector<8x32xf32>
    %409 = vector.extract_strided_slice %398 {offsets = [0, 64], sizes = [8, 32], strides = [1, 1]} : vector<8x128xf32> to vector<8x32xf32>
    %410 = math.tanh %409 : vector<8x32xf32>
    %411 = arith.mulf %407, %393 : vector<8x32xf32>
    %412 = arith.mulf %406, %410 : vector<8x32xf32>
    %413 = arith.addf %411, %412 : vector<8x32xf32>
    %414 = math.tanh %413 : vector<8x32xf32>
    %415 = arith.mulf %408, %414 : vector<8x32xf32>
    %416 = arith.index_cast %c7_i32_156 : i32 to index
    %c0_163 = arith.constant 0 : index
    %c0_164 = arith.constant 0 : index
    %417 = vector.load %arg10[%416, %c0_163, %c0_164] : memref<8x8x32xf32, #tpu.memory_space<vmem>>, vector<1x8x32xf32>
    %418 = vector.shape_cast %417 : vector<1x8x32xf32> to vector<8x32xf32>
    %419 = arith.subf %415, %390 : vector<8x32xf32>
    %420 = arith.mulf %418, %419 : vector<8x32xf32>
    %421 = arith.addf %390, %420 : vector<8x32xf32>
    %422 = arith.subf %413, %393 : vector<8x32xf32>
    %423 = arith.mulf %418, %422 : vector<8x32xf32>
    %424 = arith.addf %393, %423 : vector<8x32xf32>
    %c8_i32 = arith.constant 8 : i32
    %cst_165 = arith.constant 0.000000e+00 : f32
    %425 = vector.broadcast %cst_165 : f32 to vector<8x96xf32>
    %426 = tpu.concatenate %421, %425 in 1 : vector<8x32xf32>, vector<8x96xf32> -> vector<8x128xf32>
    %c0_166 = arith.constant 0 : index
    %c0_167 = arith.constant 0 : index
    %427 = vector.load %arg8[%c0_166, %c0_167] : memref<8x128xf32, #tpu.memory_space<vmem>>, vector<8x128xf32>
    tpu.vector_store %arg8[%c0_166, %c0_167], %426 {strides = array<i32>} : memref<8x128xf32, #tpu.memory_space<vmem>>, vector<8x128xf32>,
    return
  }
  func.func @transform_0(%arg0: i32) -> (i32, i32, i32) {
    %c0_i32 = arith.constant 0 : i32
    %c0_i32_0 = arith.constant 0 : i32
    %c0_i32_1 = arith.constant 0 : i32
    return %c0_i32, %arg0, %c0_i32_0 : i32, i32, i32
  }
  func.func @transform_1(%arg0: i32) -> (i32, i32) {
    %c0_i32 = arith.constant 0 : i32
    %c0_i32_0 = arith.constant 0 : i32
    return %arg0, %c0_i32 : i32, i32
  }
  func.func @transform_2(%arg0: i32) -> (i32, i32) {
    %c0_i32 = arith.constant 0 : i32
    %c0_i32_0 = arith.constant 0 : i32
    %c0_i32_1 = arith.constant 0 : i32
    return %c0_i32, %c0_i32_0 : i32, i32
  }
  func.func @transform_3(%arg0: i32) -> (i32, i32) {
    %c0_i32 = arith.constant 0 : i32
    %c0_i32_0 = arith.constant 0 : i32
    %c0_i32_1 = arith.constant 0 : i32
    return %c0_i32, %c0_i32_0 : i32, i32
  }
  func.func @transform_4(%arg0: i32) -> (i32, i32) {
    %c0_i32 = arith.constant 0 : i32
    %c0_i32_0 = arith.constant 0 : i32
    %c0_i32_1 = arith.constant 0 : i32
    return %c0_i32, %c0_i32_0 : i32, i32
  }
  func.func @transform_5(%arg0: i32) -> (i32, i32) {
    %c0_i32 = arith.constant 0 : i32
    %c0_i32_0 = arith.constant 0 : i32
    %c0_i32_1 = arith.constant 0 : i32
    return %c0_i32, %c0_i32_0 : i32, i32
  }
  func.func @transform_6(%arg0: i32) -> (i32, i32) {
    %c0_i32 = arith.constant 0 : i32
    %c0_i32_0 = arith.constant 0 : i32
    return %arg0, %c0_i32 : i32, i32
  }
  func.func @transform_7(%arg0: i32) -> (i32, i32) {
    %c0_i32 = arith.constant 0 : i32
    %c0_i32_0 = arith.constant 0 : i32
    return %arg0, %c0_i32 : i32, i32
  }
}

</mosaic_0001>

<bundles_post_ra>
// kernel: bilstm_encode.1
= control target key start
LH: loop header
LB: loop body
LE: loop exit
PB: predicated region body
PF: predicated region fallthrough
CT: control target
= control target key end

     0   :  { %v1896_v0 = vmov 0.0   ;;  %vm1897_vm0 = vmmov 0   ;;  %vm70_vm1 = vcmask 523264   ;;  %v1898_v12 = vmov 0.0|0.0   ;;  %s1899_s26 = smov 64   ;;  %s2275_s3 = inlined_call_operand.vmem [shape: bf16[64,128], index: 3, kind: input, shape index: {}]   ;;  %s2276_s0 = inlined_call_operand.vmem [shape: bf16[8,8,64], index: 0, kind: input, shape index: {}]   ;;  %s2277_s4 = inlined_call_operand.vmem [shape: f32[32,128], index: 4, kind: input, shape index: {}]   ;;  %s2278_s6 = inlined_call_operand.vmem [shape: f32[8,32], index: 6, kind: input, shape index: {}]   ;;  %s2279_s5 = inlined_call_operand.vmem [shape: f32[1,128], index: 5, kind: input, shape index: {}]   ;;  %s2280_s1 = inlined_call_operand.vmem [shape: s32[8,1], index: 1, kind: input, shape index: {}]   ;;  %s2281_s2 = inlined_call_operand.vmem [shape: s32[1,32], index: 2, kind: input, shape index: {}]   ;;  %s2282_s7 = inlined_call_operand.vmem [shape: f32[8,128], index: 7, kind: output, shape index: {}]  }
   0x1   :  { %1604 = vmatprep.subr.bf16.mxu0 %v1896_v0  ;;  %v1947_v1 = vld [vmem:[%s2275_s3] sm:$0xff]   ;;  %1612 = vmatprep.mubr.msk.bf16.mxu0 %vm1897_vm0, %v1896_v0  ;;  %v1958_v2 = vld [vmem:[%s2275_s3 + $0x8] sm:$0xff]   ;;  %v1967_v3 = vld [vmem:[%s2275_s3 + $0x10] sm:$0xff]   ;;  %vm126_vm2 = vcmask 261120   ;;  %v1901_v45 = vmov 0   ;;  %v116_v51 = vlaneseq }
   0x2   :  { %1616 = vmatprep.subr.bf16.mxu1 %v1896_v0  ;;  %1624 = vmatprep.mubr.msk.bf16.mxu1 %vm1897_vm0, %v1896_v0  ;;  %v1976_v4 = vld [vmem:[%s2275_s3 + $0x18] sm:$0xff]   ;;  %v39_v5 = vld [vmem:[%s2276_s0] sm:$0xf]  ;;  %v1498_v6 = vld [vmem:[%s2276_s0 + $0x8] sm:$0xf] }
   0x3   :  { %1605 = vmatpush3.bf16.msra.mxu0 %v1947_v1  ;;  %1617 = vmatpush3.bf16.msra.mxu1 %v1947_v1  ;;  %v1504_v7 = vld [vmem:[%s2276_s0 + $0x10] sm:$0xf]  ;;  %v537_v8 = vld [vmem:[%s2277_s4] sm:$0xff]  ;;  %v538_v9 = vld [vmem:[%s2277_s4 + $0x8] sm:$0xff]  ;;  %v117_v56 = vshrl.u32 %v116_v51, 7 }
   0x4   :  { %1606 = vmatprep.subr.bf16.mxu0 %v1896_v0  ;;  %1618 = vmatprep.subr.bf16.mxu1 %v1896_v0  ;;  %v1510_v10 = vld [vmem:[%s2276_s0 + $0x18] sm:$0xf]  ;;  %v2035_v11 = vpack.c.bf16 %v538_v9, %v537_v8  ;;  %v539_v13 = vld [vmem:[%s2277_s4 + $0x10] sm:$0xff]  ;;  %v2055_v16 = vld [vmem:[%s2278_s6] sm:$0xff] }
   0x5   :  { %v540_v14 = vld [vmem:[%s2277_s4 + $0x18] sm:$0xff]  ;;  %v2075_v33 = vld [vmem:[%s2279_s5] ss:$0 sm:$0xff]  ;;  %s1900_s5 = smov 32   ;;  %1843 = vset.pattern.permute.xlu0 %v1901_v45  ;;  %v1495_v50 = vld [vmem:[%s2276_s0 + $0x4] sm:$0xf] }
   0x6   :  { %v2046_v15 = vpack.c.bf16 %v540_v14, %v539_v13  ;;  %v36_v46 = vld [vmem:[%s2280_s1] sm:$0xff]  ;;  %v118_v60 = vsub.s32 0, %v117_v56  ;;  %s1902_s1 = smov 96  }
   0x7   :  { %1607 = vmatpush3.bf16.msra.mxu0 %v1958_v2  ;;  %1619 = vmatpush3.bf16.msra.mxu1 %v1958_v2  ;;  %v37_v52 = vld [vmem:[%s2281_s2] sm:$0x1] }
   0x8   :  { %1608 = vmatprep.subr.bf16.mxu0 %v1896_v0  ;;  %1620 = vmatprep.subr.bf16.mxu1 %v1896_v0  ;;  %v38_v54 = vsub.s32 1, %v37_v52  ;;  %v115_v55 = vmul.u32 7, %v37_v52  ;;  %v175_v57 = vmul.u32 6, %v37_v52 }
   0x9   :  { %v234_v58 = vmul.u32 5, %v37_v52  ;;  %v293_v59 = vmul.u32 4, %v37_v52 }
   0xa   :  { %v176_v61 = vadd.s32 %v175_v57, %v38_v54  ;;  %v233_v62 = vmul.u32 2, %v38_v54  ;;  %v292_v63 = vmul.u32 3, %v38_v54 }
   0xb   :  { %1609 = vmatpush3.bf16.msra.mxu0 %v1967_v3  ;;  %1621 = vmatpush3.bf16.msra.mxu1 %v1967_v3  ;;  %v410_v14 = vmul.u32 5, %v38_v54 }
   0xc   :  { %1610 = vmatprep.subr.bf16.mxu0 %v1896_v0  ;;  %1622 = vmatprep.subr.bf16.mxu1 %v1896_v0  ;;  %v180_v8 = vrot.slane %v176_v61, %v118_v60  ;;  %v235_v9 = vadd.s32 %v234_v58, %v233_v62 }
   0xf   :  { %1611 = vmatpush3.bf16.msra.mxu0 %v1976_v4  ;;  %1623 = vmatpush3.bf16.msra.mxu1 %v1976_v4 }
  0x10   :  { %1628 = vmatprep.subr.bf16.mxu0 %v1896_v0  ;;  %1640 = vmatprep.subr.bf16.mxu1 %v1896_v0 }
  0x12   :  { %1613 = vmatmul.mubr.msk.bf16.vlgmr.msra.gmra.mrb[0].mxu0 %vm70_vm1, %v39_v5  ;;  %1625 = vmatmul.mubr.msk.bf16.vlgmr.msra.gmra.mrb[0].mxu1 %vm70_vm1, %v1495_v50  ;;  %v351_v5 = vmul.u32 4, %v38_v54 }
  0x13   :  { %1629 = vmatpush3.bf16.msra.mxu0 %v1947_v1  ;;  %1636 = vmatprep.mubr.msk.bf16.mxu0 %vm1897_vm0, %v1896_v0 }
  0x14   :  { %1630 = vmatprep.subr.bf16.mxu0 %v1896_v0  ;;  %1641 = vmatpush3.bf16.msra.mxu1 %v1947_v1 }
  0x15   :  { %1648 = vmatprep.mubr.msk.bf16.mxu1 %vm1897_vm0, %v1896_v0  ;;  %1642 = vmatprep.subr.bf16.mxu1 %v1896_v0 }
  0x17   :  { %1631 = vmatpush3.bf16.msra.mxu0 %v1958_v2 }
  0x18   :  { %1632 = vmatprep.subr.bf16.mxu0 %v1896_v0  ;;  %1643 = vmatpush3.bf16.msra.mxu1 %v1958_v2 }
  0x19   :  { %1644 = vmatprep.subr.bf16.mxu1 %v1896_v0 }
  0x1b   :  { %1633 = vmatpush3.bf16.msra.mxu0 %v1967_v3 }
  0x1c   :  { %1634 = vmatprep.subr.bf16.mxu0 %v1896_v0  ;;  %1645 = vmatpush3.bf16.msra.mxu1 %v1967_v3 }
  0x1d   :  { %1646 = vmatprep.subr.bf16.mxu1 %v1896_v0 }
  0x1f   :  { %1635 = vmatpush3.bf16.msra.mxu0 %v1976_v4 }
  0x20   :  { %1652 = vmatprep.subr.bf16.mxu0 %v1896_v0  ;;  %1647 = vmatpush3.bf16.msra.mxu1 %v1976_v4 }
  0x21   :  { %1664 = vmatprep.subr.bf16.mxu1 %v1896_v0 }
  0x22   :  { %1637 = vmatmul.mubr.msk.bf16.vlgmr.msra.gmra.mrb[4].mxu0 %vm70_vm1, %v1498_v6  ;;  %v352_v6 = vmul.u32 3, %v37_v52 }
  0x23   :  { %1653 = vmatpush3.bf16.msra.mxu0 %v1947_v1  ;;  %1660 = vmatprep.mubr.msk.bf16.mxu0 %vm1897_vm0, %v1896_v0 }
  0x24   :  { %1654 = vmatprep.subr.bf16.mxu0 %v1896_v0  ;;  %v353_v13 = vadd.s32 %v352_v6, %v351_v5 }
  0x27   :  { %1655 = vmatpush3.bf16.msra.mxu0 %v1958_v2 }
  0x28   :  { %1656 = vmatprep.subr.bf16.mxu0 %v1896_v0 }
  0x2b   :  { %1657 = vmatpush3.bf16.msra.mxu0 %v1967_v3 }
  0x2c   :  { %1658 = vmatprep.subr.bf16.mxu0 %v1896_v0 }
  0x2f   :  { %1659 = vmatpush3.bf16.msra.mxu0 %v1976_v4 }
  0x30   :  { %1676 = vmatprep.subr.bf16.mxu0 %v1896_v0 }
  0x32   :  { %1661 = vmatmul.mubr.msk.bf16.vlgmr.msra.gmra.mrb[8].mxu0 %vm70_vm1, %v1504_v7  ;;  %v119_v7 = vrot.slane %v115_v55, %v118_v60 }
  0x33   :  { %1677 = vmatpush3.bf16.msra.mxu0 %v1947_v1  ;;  %1684 = vmatprep.mubr.msk.bf16.mxu0 %vm1897_vm0, %v1896_v0 }
  0x34   :  { %1678 = vmatprep.subr.bf16.mxu0 %v1896_v0 }
  0x37   :  { %1679 = vmatpush3.bf16.msra.mxu0 %v1958_v2 }
  0x38   :  { %1680 = vmatprep.subr.bf16.mxu0 %v1896_v0 }
  0x3b   :  { %1681 = vmatpush3.bf16.msra.mxu0 %v1967_v3 }
  0x3c   :  { %1682 = vmatprep.subr.bf16.mxu0 %v1896_v0 }
  0x3f   :  { %1683 = vmatpush3.bf16.msra.mxu0 %v1976_v4 }
  0x40   :  { %1788 = vmatprep.subr.bf16.mxu0 %v1898_v12 }
  0x42   :  { %1685 = vmatmul.mubr.msk.bf16.vlgmr.msra.gmra.mrb[12].mxu0 %vm70_vm1, %v1510_v10  ;;  %v294_v10 = vadd.s32 %v293_v59, %v292_v63 }
  0x43   :  { %1790 = vmatpush3.bf16.msra.mxu0 %v2035_v11  ;;  %1708 = vmatprep.mubr.msk.f32.mxu0 %vm1897_vm0, %v1896_v0 }
  0x44   :  { %1791 = vmatprep.subr.bf16.mxu0 %v1898_v12 }
  0x47   :  { %1793 = vmatpush3.bf16.msra.mxu0 %v2046_v15 }
  0x48   :  { %1800 = vmatprep.subr.bf16.mxu0 %v1898_v12 }
  0x4a   :  { %1709 = vmatmul.mubr.msk.f32.vlgmr.msra.gmra.mrb[16].mxu0 %vm126_vm2, %v2055_v16 }
  0x4b   :  { %1802 = vmatpush3.bf16.msra.mxu0 %v2035_v11  ;;  %1730 = vmatprep.mubr.msk.f32.mxu0 %vm1897_vm0, %v1896_v0 }
  0x4c   :  { %1803 = vmatprep.subr.bf16.mxu0 %v1898_v12 }
  0x4f   :  { %1805 = vmatpush3.bf16.msra.mxu0 %v2046_v15 }
  0x50   :  { %1812 = vmatprep.subr.bf16.mxu0 %v1898_v12 }
  0xe5   :  { %v108_v17 = vpop.f32.mrb[0].mxu0  ;;  %v167_v45 = vpop.f32.mrb[0].mxu1 }
  0xe6   :  { %v1614_v18 = vpop.f32.mrb[1].mxu0  ;;  %v109_v34 = vadd.f32 %v2075_v33, %v108_v17  ;;  %v411_v17 = vmul.u32 2, %v37_v52  ;;  %v168_v6 = vadd.f32 %v2075_v33, %v167_v45 }
  0xe7   :  { %v111_v19 = vpop.f32.mrb[2].mxu0  ;;  %v239_v18 = vrot.slane %v235_v9, %v118_v60 }
  0xe8   :  { %v1615_v20 = vpop.f32.mrb[3].mxu0  ;;  %v298_v19 = vrot.slane %v294_v10, %v118_v60 }
  0xe9   :  { %v469_v20 = vmul.u32 6, %v38_v54 }
  0xf5   :  { %v2066_v21 = vpop.f32.mrb[4].mxu0 }
  0xf6   :  { %v1638_v22 = vpop.f32.mrb[5].mxu0 }
  0xf7   :  { %v228_v23 = vpop.f32.mrb[6].mxu0  ;;  %v527_v22 = vmul.u32 7, %v38_v54 }
  0xf8   :  { %v1639_v24 = vpop.f32.mrb[7].mxu0 }
  0xf9   :  { %v357_v24 = vrot.slane %v353_v13, %v118_v60 }
 0x105   :  { %v2068_v25 = vpop.f32.mrb[8].mxu0 }
 0x106   :  { %v1662_v26 = vpop.f32.mrb[9].mxu0 }
 0x107   :  { %v346_v27 = vpop.f32.mrb[10].mxu0  ;;  %v412_v26 = vadd.s32 %v411_v17, %v410_v14 }
 0x108   :  { %v1663_v28 = vpop.f32.mrb[11].mxu0  ;;  %v470_v27 = vadd.s32 %v469_v20, %v37_v52 }
 0x109   :  { %v531_v28 = vrot.slane %v527_v22, %v118_v60 }
 0x115   :  { %v2070_v29 = vpop.f32.mrb[12].mxu0 }
 0x116   :  { %v1686_v30 = vpop.f32.mrb[13].mxu0 }
 0x117   :  { %v464_v31 = vpop.f32.mrb[14].mxu0 }
 0x118   :  { %v1687_v32 = vpop.f32.mrb[15].mxu0 }
 0x119   :  { %v416_v32 = vrot.slane %v412_v26, %v118_v60 }
 0x11d   :  { %v612_v35 = vpop.f32.mrb[16].mxu0 }
 0x11e   :  { %v616_v36 = vadd.f32 %v612_v35, %v109_v34  ;;  %v1710_v37 = vpop.f32.mrb[17].mxu0  ;;  %v474_v34 = vrot.slane %v470_v27, %v118_v60 }
 0x120   :  { %1848 = vtanh.f32 %v616_v36  ;;  %v617_v39 = vmul.f32 0.5, %v616_v36 }
 0x122   :  { %1850 = vtanh.f32 %v617_v39 }
 0x12a   :  { %v1849_v38 = vpop.eup %1848 }
 0x12b   :  { %624 = vrot.lane.b32.xlu0 %v1849_v38, %s1899_s26  ;;  %v1501_v38 = vld [vmem:[%s2276_s0 + $0xc] sm:$0xf] }
 0x12c   :  { %v1851_v40 = vpop.eup %1850  ;;  %1649 = vmatmul.mubr.msk.bf16.vlgmr.msra.gmra.mrb[4].mxu1 %vm70_vm1, %v1501_v38 }
 0x12d   :  { %v619_v41 = vmul.f32 0.5, %v1851_v40  ;;  %1665 = vmatpush3.bf16.msra.mxu1 %v1947_v1  ;;  %1672 = vmatprep.mubr.msk.bf16.mxu1 %vm1897_vm0, %v1896_v0 }
 0x12e   :  { %1666 = vmatprep.subr.bf16.mxu1 %v1896_v0 }
 0x12f   :  { %v2079_v42 = vadd.f32 0.5, %v619_v41 }
 0x131   :  { %v622_v47 = vmul.f32 0.0, %v2079_v42  ;;  %1667 = vmatpush3.bf16.msra.mxu1 %v1958_v2 }
 0x132   :  { %1668 = vmatprep.subr.bf16.mxu1 %v1896_v0 }
 0x135   :  { %1669 = vmatpush3.bf16.msra.mxu1 %v1967_v3 }
 0x136   :  { %1670 = vmatprep.subr.bf16.mxu1 %v1896_v0 }
 0x139   :  { %1671 = vmatpush3.bf16.msra.mxu1 %v1976_v4 }
 0x13a   :  { %1688 = vmatprep.subr.bf16.mxu1 %v1896_v0 }
 0x19d   :  { %v625_v43 = vpop.permute.xlu0 %624 }
 0x19e   :  { %v627_v44 = vmul.f32 %v625_v43, %v2079_v42  ;;  %v1507_v43 = vld [vmem:[%s2276_s0 + $0x14] sm:$0xf] }
 0x19f   :  { %1673 = vmatmul.mubr.msk.bf16.vlgmr.msra.gmra.mrb[8].mxu1 %vm70_vm1, %v1507_v43  ;;  %v226_v43 = vadd.f32 %v2075_v33, %v2066_v21 }
 0x1a0   :  { %629 = vrot.lane.b32.xlu0 %v627_v44, %s1900_s5  ;;  %1689 = vmatpush3.bf16.msra.mxu1 %v1947_v1  ;;  %v1513_v44 = vld [vmem:[%s2276_s0 + $0x1c] sm:$0xf] }
 0x1a1   :  { %1696 = vmatprep.mubr.msk.bf16.mxu1 %vm1897_vm0, %v1896_v0  ;;  %1690 = vmatprep.subr.bf16.mxu1 %v1896_v0 }
 0x1a4   :  { %121 = vperm.xlu0 %1843, %v36_v46   ;;  %1691 = vmatpush3.bf16.msra.mxu1 %v1958_v2  ;;  %v1626_v46 = vpop.f32.mrb[1].mxu1 }
 0x1a5   :  { %1692 = vmatprep.subr.bf16.mxu1 %v1896_v0 }
 0x1a8   :  { %1693 = vmatpush3.bf16.msra.mxu1 %v1967_v3 }
 0x1a9   :  { %1694 = vmatprep.subr.bf16.mxu1 %v1896_v0 }
 0x1ac   :  { %1695 = vmatpush3.bf16.msra.mxu1 %v1976_v4 }
 0x1ad   :  { %1794 = vmatprep.subr.bf16.mxu1 %v1898_v12 }
 0x1af   :  { %1697 = vmatmul.mubr.msk.bf16.vlgmr.msra.gmra.mrb[12].mxu1 %vm70_vm1, %v1513_v44 }
 0x1b0   :  { %1796 = vmatpush3.bf16.msra.mxu1 %v2035_v11  ;;  %1719 = vmatprep.mubr.msk.f32.mxu1 %vm1897_vm0, %v1896_v0 }
 0x1b1   :  { %1797 = vmatprep.subr.bf16.mxu1 %v1898_v12 }
 0x1b4   :  { %1799 = vmatpush3.bf16.msra.mxu1 %v2046_v15 }
 0x1b5   :  { %1806 = vmatprep.subr.bf16.mxu1 %v1898_v12 }
 0x212   :  { %v630_v48 = vpop.permute.xlu0 %629 }
 0x213   :  { %v2087_v49 = vadd.f32 %v630_v48, %v622_v47  ;;  %v170_v47 = vpop.f32.mrb[2].mxu1 }
 0x214   :  { %v1627_v48 = vpop.f32.mrb[3].mxu1 }
 0x215   :  { %1852 = vtanh.f32 %v2087_v49  ;;  %v2168_v50 = vpop.f32.mrb[4].mxu1 }
 0x216   :  { %v1650_v52 = vpop.f32.mrb[5].mxu1 }
 0x21f   :  { %v1853_v53 = vpop.eup %1852 }
 0x220   :  { %635 = vrot.lane.b32.xlu1 %v1853_v53, %s1899_s26  ;;  %v287_v53 = vpop.f32.mrb[6].mxu1 }
 0x221   :  { %v1651_v55 = vpop.f32.mrb[7].mxu1 }
 0x223   :  { %v122_v23 = vpop.permute.xlu0 %121 }
 0x224   :  { %640 = vrot.lane.b32.xlu1 %v2055_v16, %s1902_s1  ;;  %vm123_vm3 = vcmp.lt.s32.totalorder %v119_v7, %v122_v23  ;;  %vm181_vm4 = vcmp.lt.s32.totalorder %v180_v8, %v122_v23  ;;  %vm240_vm5 = vcmp.lt.s32.totalorder %v239_v18, %v122_v23  ;;  %vm299_vm6 = vcmp.lt.s32.totalorder %v298_v19, %v122_v23 }
 0x225   :  { %v1494_v30 = vsel %vm123_vm3, 1.0, %v1896_v0  ;;  %v1497_v31 = vsel %vm181_vm4, 1.0, %v1896_v0  ;;  %vm358_vm7 = vcmp.lt.s32.totalorder %v357_v24, %v122_v23  ;;  %v1500_v35 = vsel %vm240_vm5, 1.0, %v1896_v0 }
 0x226   :  { %127 = vst.msk [vmem:[#allocation3] sm:$0xff] %vm126_vm2, %v1494_v30  ;;  %185 = vst.msk [vmem:[#allocation3 + $0x8] sm:$0xff] %vm126_vm2, %v1497_v31  ;;  %v1503_v36 = vsel %vm299_vm6, 1.0, %v1896_v0  ;;  %v1506_v37 = vsel %vm358_vm7, 1.0, %v1896_v0  ;;  %vm417_vm8 = vcmp.lt.s32.totalorder %v416_v32, %v122_v23  ;;  %vm532_vm9 = vcmp.lt.s32.totalorder %v531_v28, %v122_v23 }
 0x227   :  { %244 = vst.msk [vmem:[#allocation3 + $0x10] sm:$0xff] %vm126_vm2, %v1500_v35  ;;  %303 = vst.msk [vmem:[#allocation3 + $0x18] sm:$0xff] %vm126_vm2, %v1503_v36  ;;  %v1509_v39 = vsel %vm417_vm8, 1.0, %v1896_v0  ;;  %vm475_vm10 = vcmp.lt.s32.totalorder %v474_v34, %v122_v23  ;;  %v1515_v40 = vsel %vm532_vm9, 1.0, %v1896_v0 }
 0x228   :  { %362 = vst.msk [vmem:[#allocation3 + $0x20] sm:$0xff] %vm126_vm2, %v1506_v37  ;;  %421 = vst.msk [vmem:[#allocation3 + $0x28] sm:$0xff] %vm126_vm2, %v1509_v39  ;;  %v1512_v41 = vsel %vm475_vm10, 1.0, %v1896_v0 }
 0x229   :  { %536 = vst.msk [vmem:[#allocation3 + $0x38] sm:$0xff] %vm126_vm2, %v1515_v40  ;;  %479 = vst.msk [vmem:[#allocation3 + $0x30] sm:$0xff] %vm126_vm2, %v1512_v41 }
 0x22d   :  { %v639_v51 = vld [vmem:[#allocation3] sm:$0xff]  ;;  %v757_v31 = vld [vmem:[#allocation3 + $0x8] sm:$0xff] }
 0x272   :  { %v2172_v59 = vpop.f32.mrb[8].mxu1 }
 0x292   :  { %v636_v1 = vpop.permute.xlu1 %635 }
 0x293   :  { %v638_v2 = vmul.f32 %v636_v1, %v2079_v42 }
 0x296   :  { %v641_v3 = vpop.permute.xlu1 %640 }
 0x297   :  { %v643_v4 = vsub.f32 %v638_v2, %v641_v3 }
 0x299   :  { %645 = vrot.lane.b32.xlu1 %v643_v4, %s1900_s5 }
 0x29d   :  { %651 = vrot.lane.b32.xlu1 %v2087_v49, %s1902_s1  ;;  %v1674_v49 = vpop.f32.mrb[9].mxu1 }
 0x29e   :  { %v405_v60 = vpop.f32.mrb[10].mxu1 }
 0x29f   :  { %v1675_v61 = vpop.f32.mrb[11].mxu1 }
 0x30b   :  { %v646_v54 = vpop.permute.xlu1 %645 }
 0x30c   :  { %v648_v56 = vmul.f32 %v646_v54, %v639_v51 }
 0x30e   :  { %v649_v42 = vadd.f32 %v648_v56, %v2055_v16  ;;  %v2181_v16 = vpop.f32.mrb[12].mxu1 }
 0x30f   :  { %v652_v57 = vpop.permute.xlu1 %651  ;;  %v1698_v62 = vpop.f32.mrb[13].mxu1 }
 0x310   :  { %v654_v58 = vmul.f32 %v652_v57, %v639_v51  ;;  %1720 = vmatmul.mubr.msk.f32.vlgmr.msra.gmra.mrb[16].mxu1 %vm126_vm2, %v649_v42  ;;  %v522_v63 = vpop.f32.mrb[14].mxu1  ;;  %v876_v57 = vld [vmem:[#allocation3 + $0x10] sm:$0xff] }
 0x311   :  { %1808 = vmatpush3.bf16.msra.mxu1 %v2035_v11  ;;  %1741 = vmatprep.mubr.msk.f32.mxu1 %vm1897_vm0, %v1896_v0  ;;  %v1699_v5 = vpop.f32.mrb[15].mxu1 }
 0x312   :  { %737 = vrot.lane.b32.xlu1 %v654_v58, %s1900_s5  ;;  %1809 = vmatprep.subr.bf16.mxu1 %v1898_v12 }
 0x315   :  { %1811 = vmatpush3.bf16.msra.mxu1 %v2046_v15 }
 0x316   :  { %1818 = vmatprep.subr.bf16.mxu1 %v1898_v12 }
 0x384   :  { %v738_v22 = vpop.permute.xlu1 %737 }
 0x3e3   :  { %v726_v7 = vpop.f32.mrb[16].mxu1 }
 0x3e4   :  { %v730_v8 = vadd.f32 %v726_v7, %v168_v6  ;;  %v1721_v9 = vpop.f32.mrb[17].mxu1 }
 0x3e6   :  { %1854 = vtanh.f32 %v730_v8  ;;  %v731_v13 = vmul.f32 0.5, %v730_v8  ;;  %v285_v8 = vadd.f32 %v2075_v33, %v2168_v50 }
 0x3e8   :  { %1856 = vtanh.f32 %v731_v13 }
 0x3f0   :  { %v1855_v10 = vpop.eup %1854 }
 0x3f1   :  { %742 = vrot.lane.b32.xlu0 %v1855_v10, %s1899_s26 }
 0x3f2   :  { %v1857_v14 = vpop.eup %1856 }
 0x3f3   :  { %v733_v17 = vmul.f32 0.5, %v1857_v14 }
 0x3f5   :  { %v734_v18 = vadd.f32 0.5, %v733_v17 }
 0x3f7   :  { %v740_v23 = vmul.f32 %v738_v22, %v734_v18 }
 0x463   :  { %v743_v19 = vpop.permute.xlu0 %742 }
 0x464   :  { %v745_v20 = vmul.f32 %v743_v19, %v734_v18 }
 0x466   :  { %747 = vrot.lane.b32.xlu0 %v745_v20, %s1900_s5 }
 0x46a   :  { %758 = vrot.lane.b32.xlu0 %v649_v42, %s1902_s1 }
 0x4d8   :  { %v748_v24 = vpop.permute.xlu0 %747 }
 0x4d9   :  { %v750_v26 = vadd.f32 %v748_v24, %v740_v23 }
 0x4db   :  { %1858 = vtanh.f32 %v750_v26  ;;  %v768_v27 = vsub.f32 %v750_v26, %v738_v22 }
 0x4dc   :  { %v759_v30 = vpop.permute.xlu0 %758 }
 0x4dd   :  { %770 = vrot.lane.b32.xlu0 %v768_v27, %s1902_s1 }
 0x4e5   :  { %v1859_v28 = vpop.eup %1858 }
 0x4e6   :  { %753 = vrot.lane.b32.xlu1 %v1859_v28, %s1899_s26 }
 0x54f   :  { %v771_v32 = vpop.permute.xlu0 %770 }
 0x550   :  { %v773_v34 = vmul.f32 %v771_v32, %v757_v31  ;;  %v995_v32 = vld [vmem:[#allocation3 + $0x18] sm:$0xff] }
 0x552   :  { %v774_v35 = vadd.f32 %v773_v34, %v654_v58 }
 0x554   :  { %856 = vrot.lane.b32.xlu0 %v774_v35, %s1900_s5 }
 0x558   :  { %v754_v36 = vpop.permute.xlu1 %753 }
 0x559   :  { %v756_v37 = vmul.f32 %v754_v36, %v734_v18 }
 0x55b   :  { %v761_v38 = vsub.f32 %v756_v37, %v759_v30 }
 0x55d   :  { %763 = vrot.lane.b32.xlu1 %v761_v38, %s1900_s5 }
 0x5c6   :  { %v857_v52 = vpop.permute.xlu0 %856 }
 0x5cf   :  { %v764_v39 = vpop.permute.xlu1 %763 }
 0x5d0   :  { %v766_v40 = vmul.f32 %v764_v39, %v757_v31 }
 0x5d2   :  { %v767_v41 = vadd.f32 %v766_v40, %v649_v42 }
 0x5d4   :  { %1731 = vmatmul.mubr.msk.f32.vlgmr.msra.gmra.mrb[18].mxu0 %vm126_vm2, %v767_v41 }
 0x5d5   :  { %1814 = vmatpush3.bf16.msra.mxu0 %v2035_v11  ;;  %1752 = vmatprep.mubr.msk.f32.mxu0 %vm1897_vm0, %v1896_v0 }
 0x5d6   :  { %1815 = vmatprep.subr.bf16.mxu0 %v1898_v12 }
 0x5d9   :  { %1817 = vmatpush3.bf16.msra.mxu0 %v2046_v15 }
 0x5da   :  { %1824 = vmatprep.subr.bf16.mxu0 %v1898_v12 }
 0x6a7   :  { %v845_v44 = vpop.f32.mrb[18].mxu0 }
 0x6a8   :  { %v849_v1 = vadd.f32 %v845_v44, %v226_v43  ;;  %v1732_v2 = vpop.f32.mrb[19].mxu0  ;;  %v344_v44 = vadd.f32 %v2075_v33, %v2068_v25 }
 0x6aa   :  { %1860 = vtanh.f32 %v849_v1  ;;  %v850_v4 = vmul.f32 0.5, %v849_v1 }
 0x6ac   :  { %1862 = vtanh.f32 %v850_v4 }
 0x6b4   :  { %v1861_v3 = vpop.eup %1860 }
 0x6b5   :  { %861 = vrot.lane.b32.xlu1 %v1861_v3, %s1899_s26 }
 0x6b6   :  { %v1863_v45 = vpop.eup %1862 }
 0x6b7   :  { %v852_v46 = vmul.f32 0.5, %v1863_v45 }
 0x6b9   :  { %v853_v47 = vadd.f32 0.5, %v852_v46 }
 0x6bb   :  { %v859_v21 = vmul.f32 %v857_v52, %v853_v47 }
 0x727   :  { %v862_v48 = vpop.permute.xlu1 %861 }
 0x728   :  { %v864_v51 = vmul.f32 %v862_v48, %v853_v47 }
 0x72a   :  { %866 = vrot.lane.b32.xlu1 %v864_v51, %s1900_s5 }
 0x72e   :  { %877 = vrot.lane.b32.xlu1 %v767_v41, %s1902_s1 }
 0x79c   :  { %v867_v53 = vpop.permute.xlu1 %866 }
 0x79d   :  { %v869_v54 = vadd.f32 %v867_v53, %v859_v21 }
 0x79f   :  { %1864 = vtanh.f32 %v869_v54  ;;  %v887_v55 = vsub.f32 %v869_v54, %v857_v52 }
 0x7a0   :  { %v878_v42 = vpop.permute.xlu1 %877 }
 0x7a1   :  { %889 = vrot.lane.b32.xlu1 %v887_v55, %s1902_s1 }
 0x7a9   :  { %v1865_v56 = vpop.eup %1864 }
 0x7aa   :  { %872 = vrot.lane.b32.xlu0 %v1865_v56, %s1899_s26 }
 0x813   :  { %v890_v58 = vpop.permute.xlu1 %889 }
 0x814   :  { %v892_v49 = vmul.f32 %v890_v58, %v876_v57 }
 0x816   :  { %v893_v60 = vadd.f32 %v892_v49, %v774_v35 }
 0x818   :  { %975 = vrot.lane.b32.xlu1 %v893_v60, %s1900_s5 }
 0x81c   :  { %v873_v61 = vpop.permute.xlu0 %872 }
 0x81d   :  { %v875_v62 = vmul.f32 %v873_v61, %v853_v47 }
 0x81f   :  { %v880_v63 = vsub.f32 %v875_v62, %v878_v42 }
 0x821   :  { %882 = vrot.lane.b32.xlu0 %v880_v63, %s1900_s5 }
 0x88a   :  { %v976_v24 = vpop.permute.xlu1 %975 }
 0x893   :  { %v883_v5 = vpop.permute.xlu0 %882 }
 0x894   :  { %v885_v6 = vmul.f32 %v883_v5, %v876_v57  ;;  %v1114_v57 = vld [vmem:[#allocation3 + $0x20] sm:$0xff] }
 0x896   :  { %v886_v7 = vadd.f32 %v885_v6, %v767_v41 }
 0x898   :  { %1742 = vmatmul.mubr.msk.f32.vlgmr.msra.gmra.mrb[18].mxu1 %vm126_vm2, %v886_v7 }
 0x899   :  { %1820 = vmatpush3.bf16.msra.mxu1 %v2035_v11  ;;  %1763 = vmatprep.mubr.msk.f32.mxu1 %vm1897_vm0, %v1896_v0 }
 0x89a   :  { %1821 = vmatprep.subr.bf16.mxu1 %v1898_v12 }
 0x89d   :  { %1823 = vmatpush3.bf16.msra.mxu1 %v2046_v15 }
 0x89e   :  { %1830 = vmatprep.subr.bf16.mxu1 %v1898_v12 }
 0x96b   :  { %v964_v9 = vpop.f32.mrb[18].mxu1 }
 0x96c   :  { %v968_v10 = vadd.f32 %v964_v9, %v285_v8  ;;  %v1743_v13 = vpop.f32.mrb[19].mxu1  ;;  %v403_v8 = vadd.f32 %v2075_v33, %v2172_v59 }
 0x96e   :  { %1866 = vtanh.f32 %v968_v10  ;;  %v969_v17 = vmul.f32 0.5, %v968_v10 }
 0x970   :  { %1868 = vtanh.f32 %v969_v17 }
 0x978   :  { %v1867_v14 = vpop.eup %1866 }
 0x979   :  { %980 = vrot.lane.b32.xlu0 %v1867_v14, %s1899_s26 }
 0x97a   :  { %v1869_v18 = vpop.eup %1868 }
 0x97b   :  { %v971_v19 = vmul.f32 0.5, %v1869_v18 }
 0x97d   :  { %v972_v20 = vadd.f32 0.5, %v971_v19 }
 0x97f   :  { %v978_v50 = vmul.f32 %v976_v24, %v972_v20 }
 0x9eb   :  { %v981_v22 = vpop.permute.xlu0 %980 }
 0x9ec   :  { %v983_v23 = vmul.f32 %v981_v22, %v972_v20 }
 0x9ee   :  { %985 = vrot.lane.b32.xlu0 %v983_v23, %s1900_s5 }
 0x9f2   :  { %996 = vrot.lane.b32.xlu0 %v886_v7, %s1902_s1 }
 0xa60   :  { %v986_v26 = vpop.permute.xlu0 %985 }
 0xa61   :  { %v988_v27 = vadd.f32 %v986_v26, %v978_v50  ;;  %v1233_v26 = vld [vmem:[#allocation3 + $0x28] sm:$0xff] }
 0xa63   :  { %1870 = vtanh.f32 %v988_v27  ;;  %v1006_v28 = vsub.f32 %v988_v27, %v976_v24 }
 0xa64   :  { %v997_v31 = vpop.permute.xlu0 %996 }
 0xa65   :  { %1008 = vrot.lane.b32.xlu0 %v1006_v28, %s1902_s1 }
 0xa6d   :  { %v1871_v30 = vpop.eup %1870 }
 0xa6e   :  { %991 = vrot.lane.b32.xlu1 %v1871_v30, %s1899_s26 }
 0xad7   :  { %v1009_v34 = vpop.permute.xlu0 %1008 }
 0xad8   :  { %v1011_v35 = vmul.f32 %v1009_v34, %v995_v32 }
 0xada   :  { %v1012_v36 = vadd.f32 %v1011_v35, %v893_v60 }
 0xadc   :  { %1094 = vrot.lane.b32.xlu0 %v1012_v36, %s1900_s5 }
 0xae0   :  { %v992_v37 = vpop.permute.xlu1 %991 }
 0xae1   :  { %v994_v38 = vmul.f32 %v992_v37, %v972_v20 }
 0xae3   :  { %v999_v39 = vsub.f32 %v994_v38, %v997_v31  ;;  %v462_v38 = vadd.f32 %v2075_v33, %v2070_v29 }
 0xae5   :  { %1001 = vrot.lane.b32.xlu1 %v999_v39, %s1900_s5 }
 0xb4e   :  { %v1095_v21 = vpop.permute.xlu0 %1094 }
 0xb57   :  { %v1002_v40 = vpop.permute.xlu1 %1001 }
 0xb58   :  { %v1004_v41 = vmul.f32 %v1002_v40, %v995_v32 }
 0xb5a   :  { %v1005_v43 = vadd.f32 %v1004_v41, %v886_v7 }
 0xb5c   :  { %1753 = vmatmul.mubr.msk.f32.vlgmr.msra.gmra.mrb[20].mxu0 %vm126_vm2, %v1005_v43 }
 0xb5d   :  { %1826 = vmatpush3.bf16.msra.mxu0 %v2035_v11  ;;  %1774 = vmatprep.mubr.msk.f32.mxu0 %vm1897_vm0, %v1896_v0 }
 0xb5e   :  { %1827 = vmatprep.subr.bf16.mxu0 %v1898_v12 }
 0xb61   :  { %1829 = vmatpush3.bf16.msra.mxu0 %v2046_v15 }
 0xc2f   :  { %v1083_v1 = vpop.f32.mrb[20].mxu0 }
 0xc30   :  { %v1087_v2 = vadd.f32 %v1083_v1, %v344_v44  ;;  %v1754_v3 = vpop.f32.mrb[21].mxu0 }
 0xc32   :  { %1872 = vtanh.f32 %v1087_v2  ;;  %v1088_v45 = vmul.f32 0.5, %v1087_v2 }
 0xc34   :  { %1874 = vtanh.f32 %v1088_v45 }
 0xc3c   :  { %v1873_v4 = vpop.eup %1872 }
 0xc3d   :  { %1099 = vrot.lane.b32.xlu1 %v1873_v4, %s1899_s26 }
 0xc3e   :  { %v1875_v46 = vpop.eup %1874 }
 0xc3f   :  { %v1090_v47 = vmul.f32 0.5, %v1875_v46 }
 0xc41   :  { %v1091_v48 = vadd.f32 0.5, %v1090_v47 }
 0xc43   :  { %v1097_v25 = vmul.f32 %v1095_v21, %v1091_v48 }
 0xcaf   :  { %v1100_v51 = vpop.permute.xlu1 %1099 }
 0xcb0   :  { %v1102_v52 = vmul.f32 %v1100_v51, %v1091_v48 }
 0xcb2   :  { %1104 = vrot.lane.b32.xlu1 %v1102_v52, %s1900_s5 }
 0xcb6   :  { %1115 = vrot.lane.b32.xlu1 %v1005_v43, %s1902_s1 }
 0xd24   :  { %v1105_v53 = vpop.permute.xlu1 %1104 }
 0xd25   :  { %v1107_v54 = vadd.f32 %v1105_v53, %v1097_v25  ;;  %v1352_v25 = vld [vmem:[#allocation3 + $0x30] sm:$0xff] }
 0xd27   :  { %1876 = vtanh.f32 %v1107_v54  ;;  %v1125_v55 = vsub.f32 %v1107_v54, %v1095_v21 }
 0xd28   :  { %v1116_v42 = vpop.permute.xlu1 %1115 }
 0xd29   :  { %1127 = vrot.lane.b32.xlu1 %v1125_v55, %s1902_s1 }
 0xd31   :  { %v1877_v56 = vpop.eup %1876 }
 0xd32   :  { %1110 = vrot.lane.b32.xlu0 %v1877_v56, %s1899_s26 }
 0xd9b   :  { %v1128_v58 = vpop.permute.xlu1 %1127 }
 0xd9c   :  { %v1130_v49 = vmul.f32 %v1128_v58, %v1114_v57 }
 0xd9e   :  { %v1131_v60 = vadd.f32 %v1130_v49, %v1012_v36 }
 0xda0   :  { %1213 = vrot.lane.b32.xlu1 %v1131_v60, %s1900_s5 }
 0xda4   :  { %v1111_v61 = vpop.permute.xlu0 %1110 }
 0xda5   :  { %v1113_v62 = vmul.f32 %v1111_v61, %v1091_v48  ;;  %v520_v61 = vadd.f32 %v2075_v33, %v2181_v16 }
 0xda7   :  { %v1118_v63 = vsub.f32 %v1113_v62, %v1116_v42 }
 0xda9   :  { %1120 = vrot.lane.b32.xlu0 %v1118_v63, %s1900_s5 }
 0xe1b   :  { %v1121_v5 = vpop.permute.xlu0 %1120 }
 0xe1c   :  { %v1123_v6 = vmul.f32 %v1121_v5, %v1114_v57 }
 0xe1e   :  { %v1124_v7 = vadd.f32 %v1123_v6, %v1005_v43 }
 0xe20   :  { %1764 = vmatmul.mubr.msk.f32.vlgmr.msra.gmra.mrb[20].mxu1 %vm126_vm2, %v1124_v7 }
 0xe21   :  { %1832 = vmatpush3.bf16.msra.mxu1 %v2035_v11  ;;  %1785 = vmatprep.mubr.msk.f32.mxu1 %vm1897_vm0, %v1896_v0 }
 0xe22   :  { %1833 = vmatprep.subr.bf16.mxu1 %v1898_v12  ;;  %v1214_v12 = vpop.permute.xlu1 %1213 }
 0xe25   :  { %1835 = vmatpush3.bf16.msra.mxu1 %v2046_v15 }
 0xef3   :  { %v1202_v9 = vpop.f32.mrb[20].mxu1 }
 0xef4   :  { %v1206_v10 = vadd.f32 %v1202_v9, %v403_v8  ;;  %v1765_v13 = vpop.f32.mrb[21].mxu1 }
 0xef6   :  { %1878 = vtanh.f32 %v1206_v10  ;;  %v1207_v17 = vmul.f32 0.5, %v1206_v10 }
 0xef8   :  { %1880 = vtanh.f32 %v1207_v17 }
 0xf00   :  { %v1879_v14 = vpop.eup %1878 }
 0xf01   :  { %1218 = vrot.lane.b32.xlu0 %v1879_v14, %s1899_s26 }
 0xf02   :  { %v1881_v11 = vpop.eup %1880 }
 0xf03   :  { %v1209_v18 = vmul.f32 0.5, %v1881_v11 }
 0xf05   :  { %v1210_v19 = vadd.f32 0.5, %v1209_v18 }
 0xf07   :  { %v1216_v15 = vmul.f32 %v1214_v12, %v1210_v19 }
 0xf73   :  { %v1219_v0 = vpop.permute.xlu0 %1218 }
 0xf74   :  { %v1221_v20 = vmul.f32 %v1219_v0, %v1210_v19 }
 0xf76   :  { %1223 = vrot.lane.b32.xlu0 %v1221_v20, %s1900_s5 }
 0xf7a   :  { %1234 = vrot.lane.b32.xlu0 %v1124_v7, %s1902_s1 }
 0xfe8   :  { %v1224_v59 = vpop.permute.xlu0 %1223 }
 0xfe9   :  { %v1226_v22 = vadd.f32 %v1224_v59, %v1216_v15  ;;  %v1471_v15 = vld [vmem:[#allocation3 + $0x38] sm:$0xff] }
 0xfeb   :  { %1882 = vtanh.f32 %v1226_v22  ;;  %v1244_v23 = vsub.f32 %v1226_v22, %v1214_v12 }
 0xfec   :  { %v1235_v50 = vpop.permute.xlu0 %1234 }
 0xfed   :  { %1246 = vrot.lane.b32.xlu0 %v1244_v23, %s1902_s1 }
 0xff5   :  { %v1883_v24 = vpop.eup %1882 }
 0xff6   :  { %1229 = vrot.lane.b32.xlu1 %v1883_v24, %s1899_s26 }
0x105f   :  { %v1247_v27 = vpop.permute.xlu0 %1246 }
0x1060   :  { %v1249_v28 = vmul.f32 %v1247_v27, %v1233_v26 }
0x1062   :  { %v1250_v30 = vadd.f32 %v1249_v28, %v1131_v60 }
0x1064   :  { %1332 = vrot.lane.b32.xlu0 %v1250_v30, %s1900_s5 }
0x1068   :  { %v1230_v31 = vpop.permute.xlu1 %1229 }
0x1069   :  { %v1232_v32 = vmul.f32 %v1230_v31, %v1210_v19 }
0x106b   :  { %v1237_v34 = vsub.f32 %v1232_v32, %v1235_v50 }
0x106d   :  { %1239 = vrot.lane.b32.xlu1 %v1237_v34, %s1900_s5 }
0x10d6   :  { %v1333_v46 = vpop.permute.xlu0 %1332 }
0x10df   :  { %v1240_v35 = vpop.permute.xlu1 %1239 }
0x10e0   :  { %v1242_v36 = vmul.f32 %v1240_v35, %v1233_v26 }
0x10e2   :  { %v1243_v37 = vadd.f32 %v1242_v36, %v1124_v7 }
0x10e4   :  { %1775 = vmatmul.mubr.msk.f32.vlgmr.msra.gmra.mrb[22].mxu0 %vm126_vm2, %v1243_v37 }
0x11b7   :  { %v1321_v39 = vpop.f32.mrb[22].mxu0 }
0x11b8   :  { %v1325_v40 = vadd.f32 %v1321_v39, %v462_v38  ;;  %v1776_v41 = vpop.f32.mrb[23].mxu0 }
0x11ba   :  { %1884 = vtanh.f32 %v1325_v40  ;;  %v1326_v44 = vmul.f32 0.5, %v1325_v40 }
0x11bc   :  { %1886 = vtanh.f32 %v1326_v44 }
0x11c4   :  { %v1885_v43 = vpop.eup %1884 }
0x11c5   :  { %1337 = vrot.lane.b32.xlu1 %v1885_v43, %s1899_s26 }
0x11c6   :  { %v1887_v1 = vpop.eup %1886 }
0x11c7   :  { %v1328_v2 = vmul.f32 0.5, %v1887_v1 }
0x11c9   :  { %v1329_v3 = vadd.f32 0.5, %v1328_v2 }
0x11cb   :  { %v1335_v29 = vmul.f32 %v1333_v46, %v1329_v3 }
0x1237   :  { %v1338_v4 = vpop.permute.xlu1 %1337 }
0x1238   :  { %v1340_v45 = vmul.f32 %v1338_v4, %v1329_v3 }
0x123a   :  { %1342 = vrot.lane.b32.xlu1 %v1340_v45, %s1900_s5 }
0x123e   :  { %1353 = vrot.lane.b32.xlu1 %v1243_v37, %s1902_s1 }
0x12ac   :  { %v1343_v47 = vpop.permute.xlu1 %1342 }
0x12ad   :  { %v1345_v48 = vadd.f32 %v1343_v47, %v1335_v29 }
0x12af   :  { %1888 = vtanh.f32 %v1345_v48  ;;  %v1363_v51 = vsub.f32 %v1345_v48, %v1333_v46 }
0x12b0   :  { %v1354_v21 = vpop.permute.xlu1 %1353 }
0x12b1   :  { %1365 = vrot.lane.b32.xlu1 %v1363_v51, %s1902_s1 }
0x12b9   :  { %v1889_v52 = vpop.eup %1888 }
0x12ba   :  { %1348 = vrot.lane.b32.xlu0 %v1889_v52, %s1899_s26 }
0x1323   :  { %v1366_v53 = vpop.permute.xlu1 %1365 }
0x1324   :  { %v1368_v54 = vmul.f32 %v1366_v53, %v1352_v25 }
0x1326   :  { %v1369_v55 = vadd.f32 %v1368_v54, %v1250_v30 }
0x1328   :  { %1451 = vrot.lane.b32.xlu1 %v1369_v55, %s1900_s5 }
0x132c   :  { %v1349_v56 = vpop.permute.xlu0 %1348 }
0x132d   :  { %v1351_v42 = vmul.f32 %v1349_v56, %v1329_v3 }
0x132f   :  { %v1356_v57 = vsub.f32 %v1351_v42, %v1354_v21 }
0x1331   :  { %1358 = vrot.lane.b32.xlu0 %v1356_v57, %s1900_s5 }
0x139a   :  { %v1452_v17 = vpop.permute.xlu1 %1451 }
0x13a3   :  { %v1359_v58 = vpop.permute.xlu0 %1358 }
0x13a4   :  { %v1361_v49 = vmul.f32 %v1359_v58, %v1352_v25 }
0x13a6   :  { %v1362_v60 = vadd.f32 %v1361_v49, %v1243_v37 }
0x13a8   :  { %1786 = vmatmul.mubr.msk.f32.vlgmr.msra.gmra.mrb[22].mxu1 %vm126_vm2, %v1362_v60 }
0x147b   :  { %v1440_v62 = vpop.f32.mrb[22].mxu1 }
0x147c   :  { %v1444_v63 = vadd.f32 %v1440_v62, %v520_v61  ;;  %v1787_v5 = vpop.f32.mrb[23].mxu1 }
0x147e   :  { %1890 = vtanh.f32 %v1444_v63  ;;  %v1445_v7 = vmul.f32 0.5, %v1444_v63 }
0x1480   :  { %1892 = vtanh.f32 %v1445_v7 }
0x1488   :  { %v1891_v6 = vpop.eup %1890 }
0x1489   :  { %1456 = vrot.lane.b32.xlu0 %v1891_v6, %s1899_s26 }
0x148a   :  { %v1893_v8 = vpop.eup %1892 }
0x148b   :  { %v1447_v9 = vmul.f32 0.5, %v1893_v8 }
0x148d   :  { %v1448_v10 = vadd.f32 0.5, %v1447_v9 }
0x148f   :  { %v1454_v33 = vmul.f32 %v1452_v17, %v1448_v10 }
0x14fb   :  { %v1457_v13 = vpop.permute.xlu0 %1456 }
0x14fc   :  { %v1459_v14 = vmul.f32 %v1457_v13, %v1448_v10 }
0x14fe   :  { %1461 = vrot.lane.b32.xlu0 %v1459_v14, %s1900_s5 }
0x1502   :  { %1472 = vrot.lane.b32.xlu0 %v1362_v60, %s1902_s1 }
0x1570   :  { %v1462_v16 = vpop.permute.xlu0 %1461 }
0x1571   :  { %v1464_v11 = vadd.f32 %v1462_v16, %v1454_v33 }
0x1573   :  { %1894 = vtanh.f32 %v1464_v11 }
0x1574   :  { %v1473_v20 = vpop.permute.xlu0 %1472 }
0x157d   :  { %v1895_v18 = vpop.eup %1894 }
0x157e   :  { %1467 = vrot.lane.b32.xlu1 %v1895_v18, %s1899_s26 }
0x15f0   :  { %v1468_v19 = vpop.permute.xlu1 %1467 }
0x15f1   :  { %v1470_v0 = vmul.f32 %v1468_v19, %v1448_v10 }
0x15f3   :  { %v1475_v12 = vsub.f32 %v1470_v0, %v1473_v20 }
0x15f5   :  { %1477 = vrot.lane.b32.xlu1 %v1475_v12, %s1900_s5 }
0x1667   :  { %v1478_v59 = vpop.permute.xlu1 %1477 }
0x1668   :  { %v1480_v22 = vmul.f32 %v1478_v59, %v1471_v15 }
0x166a   :  { %v1481_v23 = vadd.f32 %v1480_v22, %v1362_v60 }
0x166c   :  { %v1482_v24 = vsel %vm126_vm2, %v1481_v23, 0.0 }
0x166d   :  { %1483 = vst [vmem:[%s2282_s7] sm:$0xff] %v1482_v24 }

</bundles_post_ra>
